<compile_context>
chip_gen: v7x
topology: tpu7x:2x2x1
jax: 0.10.0
libtpu: 0.0.40
codegen_flags: <defaults>
</compile_context>

<pallas_src>
import jax
import jax.numpy as jnp
from jax import lax
from jax.experimental import pallas as pl
from jax.experimental.pallas import tpu as pltpu

_BF16 = jnp.bfloat16


def _softmax_last(x):
    """Numerically-stable softmax over the lane (last) axis.

    The divide is replaced by an EUP approximate reciprocal (otherwise-idle
    slot); accuracy impact is far below the test tolerance."""
    m = jnp.max(x, axis=-1, keepdims=True)
    e = jnp.exp(x - m)
    return e * pl.reciprocal(jnp.sum(e, axis=-1, keepdims=True), approx=True)


def _mlp_bf16(x_bf16, w1_ref, b1_ref, w2_ref, b2_ref):
    """Linear -> ReLU -> Linear -> ReLU.

    bf16 MXU operands, f32 accumulation; dropouts are identity at inference."""
    h = jnp.maximum(
        jnp.dot(x_bf16, w1_ref[...].astype(_BF16),
                preferred_element_type=jnp.float32) + b1_ref[...], 0.0)
    return jnp.maximum(
        jnp.dot(h.astype(_BF16), w2_ref[...].astype(_BF16),
                preferred_element_type=jnp.float32) + b2_ref[...], 0.0)


def attention_kernel(
    s1_ref, s2_ref,
    aw1_ref, ab1_ref, aw2_ref, ab2_ref,             # attend MLP (H -> H -> H)
    cw1a_ref, cw1b_ref, cb1_ref, cw2_ref, cb2_ref,  # compare MLP (2H -> H -> H), W1 split
    gw1a_ref, gw1b_ref, gb1_ref, gw2_ref, gb2_ref,  # aggregate MLP (2H -> H -> H), W1 split
    ow_ref, ob_ref,                                 # output Linear (H -> C)
    out_ref,
    x_scr, a_scr,                                   # persistent VMEM scratch (rows, H)
):
    s1 = s1_ref[...]                      # (Bb, L1, H)
    s2 = s2_ref[...]                      # (Bb, L2, H)
    bb, l1, hdim = s1.shape
    l2 = s2.shape[1]
    m1 = bb * l1
    m2 = bb * l2

    # Stack [s1; s2] rows into a persistent VMEM scratch (sublane-axis stack;
    # no fresh concatenate buffer materialized each grid step).
    x_scr[:m1, :] = s1.reshape(m1, hdim)
    x_scr[m1:, :] = s2.reshape(m2, hdim)
    xb = x_scr[...].astype(_BF16)                   # (Bb*(L1+L2), H) MXU operand

    # ---- attend: one fused MLP for both sentences ----
    f = _mlp_bf16(xb, aw1_ref, ab1_ref, aw2_ref, ab2_ref)      # f32
    f1 = f[:m1].reshape(bb, l1, hdim).astype(_BF16)
    f2 = f[m1:].reshape(bb, l2, hdim).astype(_BF16)

    # scores[b,l,m] = f1[b,l,:] . f2[b,m,:]; scores^T recomputed on the MXU
    # (cheap at L x L, guaranteed-lowerable contraction) instead of a physical
    # sub-tile transpose or a sublane-axis softmax.
    dn = (((2,), (2,)), ((0,), (0,)))
    scores = lax.dot_general(f1, f2, dn, preferred_element_type=jnp.float32)    # (Bb,L1,L2)
    scores_t = lax.dot_general(f2, f1, dn, preferred_element_type=jnp.float32)  # (Bb,L2,L1)

    prob1 = _softmax_last(scores)      # softmax over L2  (PyTorch prob1)
    prob2 = _softmax_last(scores_t)    # softmax over L1  (PyTorch prob2)

    # attended vectors: bmm(prob, other sentence)
    dn_av = (((2,), (1,)), ((0,), (0,)))
    a1 = lax.dot_general(prob1.astype(_BF16), s2.astype(_BF16), dn_av,
                         preferred_element_type=jnp.float32)   # (Bb,L1,H)
    a2 = lax.dot_general(prob2.astype(_BF16), s1.astype(_BF16), dn_av,
                         preferred_element_type=jnp.float32)   # (Bb,L2,H)
    a_scr[:m1, :] = a1.reshape(m1, hdim)
    a_scr[m1:, :] = a2.reshape(m2, hdim)
    ab = a_scr[...].astype(_BF16)

    # ---- compare: fused, split 2H weight: cat([x, a], -1) @ W1 == x@W1a + a@W1b ----
    c_h = jnp.maximum(
        jnp.dot(xb, cw1a_ref[...].astype(_BF16), preferred_element_type=jnp.float32)
        + jnp.dot(ab, cw1b_ref[...].astype(_BF16), preferred_element_type=jnp.float32)
        + cb1_ref[...], 0.0)
    g = jnp.maximum(
        jnp.dot(c_h.astype(_BF16), cw2_ref[...].astype(_BF16),
                preferred_element_type=jnp.float32) + cb2_ref[...], 0.0)

    # ---- aggregate: sum-pool over sequence, split-weight first layer ----
    # Only Bb rows feed these matmuls — keep them f32 for accuracy (negligible cost).
    v1 = jnp.sum(g[:m1].reshape(bb, l1, hdim), axis=1)   # (Bb, H)
    v2 = jnp.sum(g[m1:].reshape(bb, l2, hdim), axis=1)   # (Bb, H)
    t1 = jnp.maximum(
        jnp.dot(v1, gw1a_ref[...], preferred_element_type=jnp.float32)
        + jnp.dot(v2, gw1b_ref[...], preferred_element_type=jnp.float32)
        + gb1_ref[...], 0.0)
    t2 = jnp.maximum(
        jnp.dot(t1, gw2_ref[...], preferred_element_type=jnp.float32)
        + gb2_ref[...], 0.0)

    # ---- output Linear + log_softmax ----
    logits = jnp.dot(t2, ow_ref[...], preferred_element_type=jnp.float32) + ob_ref[...]
    m = jnp.max(logits, axis=-1, keepdims=True)
    out_ref[...] = logits - m - jnp.log(
        jnp.sum(jnp.exp(logits - m), axis=-1, keepdims=True))


def _num_tensorcores():
    """v7x packs 2 TensorCores per chip; v5e/v6e have 1 (default to 1 if unknown)."""
    try:
        kind = jax.devices()[0].device_kind.lower()
    except Exception:
        return 1
    return 2 if "7" in kind else 1


def _choose_block_b(B, L1, L2, H, num_tensorcores=1,
                    target_rows=1024, vmem_budget_bytes=24 << 20):
    """Pick the batch block Bb.

      * Output-block sublane alignment: Bb must be a multiple of 8 or == B so
        the 2-D (Bb, C) output block obeys the (8,128)-or-full-dim rule.
      * Prefer the largest block with Bb*(L1+L2) <= target_rows and the
        pipelined VMEM footprint under budget: per-grid-step overhead
        (~0.35 us) dominates at small shapes, so fewer, bigger steps win.
      * Only on multi-TC chips (v7x) prefer a step count that is a multiple of
        the core count so the "parallel" batch axis can shard across cores;
        on single-TC v5e/v6e one grid step is ideal.
    """
    rows_per_b = L1 + L2
    bytes_per_b = rows_per_b * H * 4

    def vmem_ok(bb):
        # 2 inputs x 2 pipeline buffers + 2 persistent scratch slabs, per batch row.
        return bb * bytes_per_b * 6 <= vmem_budget_bytes

    divisors = [d for d in range(1, B + 1) if B % d == 0]
    aligned = [d for d in divisors if d % 8 == 0 or d == B]          # always non-empty (d == B)
    fits = [d for d in aligned if d * rows_per_b <= target_rows and vmem_ok(d)] \
        or [min(aligned)]
    bb = max(fits)
    if num_tensorcores > 1:
        sharded = [d for d in fits if (B // d) % num_tensorcores == 0]
        if sharded:
            bb = max(sharded)
    return bb


def attention_model_forward(s1, s2, params, block_b=None, num_tensorcores=None):
    B, L1, H = s1.shape
    _, L2, _ = s2.shape
    C = params["ob"].shape[1]

    if num_tensorcores is None:
        num_tensorcores = _num_tensorcores()
    if block_b is None:
        block_b = _choose_block_b(B, L1, L2, H, num_tensorcores)
    assert B % block_b == 0, (B, block_b)
    assert block_b % 8 == 0 or block_b == B, (B, block_b)   # output sublane alignment

    # Split the 2H-wide first-layer weights at trace time (free) so the kernel
    # never concatenates on the lane axis.
    cw1a, cw1b = params["cw1"][:H], params["cw1"][H:]
    gw1a, gw1b = params["gw1"][:H], params["gw1"][H:]

    # Weights/biases: full blocks with a constant index_map.  Default
    # buffering is kept — at H=32 the doubled weight VMEM is ~50 KiB and the
    # grid is typically one step.  At scaled-up H (esp. v7x's 64 MiB VMEM),
    # switch these to pipeline_mode=pl.Buffered(1) and re-derive block_b
    # against vmem_limit_bytes.
    full = lambda a: pl.BlockSpec(a.shape, lambda i: (0,) * a.ndim)

    rows = block_b * (L1 + L2)

    in_specs = [
        pl.BlockSpec((block_b, L1, H), lambda i: (i, 0, 0)),
        pl.BlockSpec((block_b, L2, H), lambda i: (i, 0, 0)),
        full(params["aw1"]), full(params["ab1"]),
        full(params["aw2"]), full(params["ab2"]),
        full(cw1a), full(cw1b), full(params["cb1"]),
        full(params["cw2"]), full(params["cb2"]),
        full(gw1a), full(gw1b), full(params["gb1"]),
        full(params["gw2"]), full(params["gb2"]),
        full(params["ow"]), full(params["ob"]),
    ]

    return pl.pallas_call(
        attention_kernel,
        out_shape=jax.ShapeDtypeStruct((B, C), jnp.float32),
        grid_spec=pltpu.PrefetchScalarGridSpec(
            num_scalar_prefetch=0,
            grid=(B // block_b,),
            in_specs=in_specs,
            out_specs=pl.BlockSpec((block_b, C), lambda i: (i, 0)),
            scratch_shapes=[
                pltpu.VMEM((rows, H), jnp.float32),   # stacked [s1; s2] rows
                pltpu.VMEM((rows, H), jnp.float32),   # stacked attended rows
            ]),
        compiler_params=pltpu.CompilerParams(
            dimension_semantics=("parallel",),
            vmem_limit_bytes=32 << 20),
    )(
        s1, s2,
        params["aw1"], params["ab1"], params["aw2"], params["ab2"],
        cw1a, cw1b, params["cb1"], params["cw2"], params["cb2"],
        gw1a, gw1b, params["gb1"], params["gw2"], params["gb2"],
        params["ow"], params["ob"],
    )


def _mlp_ref(x, w1, b1, w2, b2):
    h = jnp.maximum(x @ w1 + b1, 0.0)
    return jnp.maximum(h @ w2 + b2, 0.0)


def reference_forward(s1, s2, p):
    """Pure-JAX f32 reference mirroring the PyTorch forward (inference mode)."""
    f1 = _mlp_ref(s1, p["aw1"], p["ab1"], p["aw2"], p["ab2"])
    f2 = _mlp_ref(s2, p["aw1"], p["ab1"], p["aw2"], p["ab2"])
    scores = jnp.einsum("bik,bjk->bij", f1, f2)                       # (B, L1, L2)
    prob1 = jax.nn.softmax(scores, axis=-1)                           # over L2
    prob2 = jax.nn.softmax(jnp.swapaxes(scores, 1, 2), axis=-1)       # over L1, (B, L2, L1)
    s1_w = jnp.concatenate([s1, jnp.einsum("bij,bjk->bik", prob1, s2)], axis=2)
    s2_w = jnp.concatenate([s2, jnp.einsum("bij,bjk->bik", prob2, s1)], axis=2)
    g1 = _mlp_ref(s1_w, p["cw1"], p["cb1"], p["cw2"], p["cb2"])
    g2 = _mlp_ref(s2_w, p["cw1"], p["cb1"], p["cw2"], p["cb2"])
    v = jnp.concatenate([jnp.sum(g1, axis=1), jnp.sum(g2, axis=1)], axis=1)
    h = _mlp_ref(v, p["gw1"], p["gb1"], p["gw2"], p["gb2"])
    logits = h @ p["ow"] + p["ob"]
    return jax.nn.log_softmax(logits, axis=-1)


def init_params(key, hidden_size, label_size, param_init):
    H, C = hidden_size, label_size
    keys = jax.random.split(key, 14)
    n = lambda k, shape: param_init * jax.random.normal(k, shape, dtype=jnp.float32)
    return {
        # attend: H -> H -> H
        "aw1": n(keys[0], (H, H)),      "ab1": n(keys[1], (1, H)),
        "aw2": n(keys[2], (H, H)),      "ab2": n(keys[3], (1, H)),
        # compare: 2H -> H -> H
        "cw1": n(keys[4], (2 * H, H)),  "cb1": n(keys[5], (1, H)),
        "cw2": n(keys[6], (H, H)),      "cb2": n(keys[7], (1, H)),
        # aggregate: 2H -> H -> H
        "gw1": n(keys[8], (2 * H, H)),  "gb1": n(keys[9], (1, H)),
        "gw2": n(keys[10], (H, H)),     "gb2": n(keys[11], (1, H)),
        # output: H -> C
        "ow": n(keys[12], (H, C)),      "ob": n(keys[13], (1, C)),
    }


if __name__ == "__main__":
    B, L1, L2, H, C = 8, 8, 8, 32, 4
    param_init = 0.05

    key = jax.random.PRNGKey(0)
    k_s1, k_s2, k_p = jax.random.split(key, 3)
    s1 = jax.random.normal(k_s1, (B, L1, H), dtype=jnp.float32)
    s2 = jax.random.normal(k_s2, (B, L2, H), dtype=jnp.float32)
    params = init_params(k_p, H, C, param_init)

    out = jax.block_until_ready(attention_model_forward(s1, s2, params))
    ref = jax.block_until_ready(reference_forward(s1, s2, params))

    assert out.shape == (B, C), out.shape
    max_err = float(jnp.max(jnp.abs(out - ref)))
    # bf16 MXU operands + approx reciprocal => loosened tolerance vs f32 reference.
    assert jnp.allclose(out, ref, atol=2e-2, rtol=2e-2), (max_err, out, ref)

    print("KERNEL_OK")
</pallas_src>

<mosaic_0001>
module attributes {stable_mosaic.version = 11 : i64} {
  func.func @attention_kernel(%arg0: i32, %arg1: memref<8x8x32xf32, #tpu.memory_space<vmem>>, %arg2: memref<8x8x32xf32, #tpu.memory_space<vmem>>, %arg3: memref<32x32xf32, #tpu.memory_space<vmem>>, %arg4: memref<1x32xf32, #tpu.memory_space<vmem>>, %arg5: memref<32x32xf32, #tpu.memory_space<vmem>>, %arg6: memref<1x32xf32, #tpu.memory_space<vmem>>, %arg7: memref<32x32xf32, #tpu.memory_space<vmem>>, %arg8: memref<32x32xf32, #tpu.memory_space<vmem>>, %arg9: memref<1x32xf32, #tpu.memory_space<vmem>>, %arg10: memref<32x32xf32, #tpu.memory_space<vmem>>, %arg11: memref<1x32xf32, #tpu.memory_space<vmem>>, %arg12: memref<32x32xf32, #tpu.memory_space<vmem>>, %arg13: memref<32x32xf32, #tpu.memory_space<vmem>>, %arg14: memref<1x32xf32, #tpu.memory_space<vmem>>, %arg15: memref<32x32xf32, #tpu.memory_space<vmem>>, %arg16: memref<1x32xf32, #tpu.memory_space<vmem>>, %arg17: memref<32x4xf32, #tpu.memory_space<vmem>>, %arg18: memref<1x4xf32, #tpu.memory_space<vmem>>, %arg19: memref<8x4xf32, #tpu.memory_space<vmem>>, %arg20: memref<128x32xf32, #tpu.memory_space<vmem>>, %arg21: memref<128x32xf32, #tpu.memory_space<vmem>>) attributes {dimension_semantics = [#tpu.dimension_semantics<parallel>], iteration_bounds = array<i64: 1>, scalar_prefetch = 0 : i64, scratch_operands = 2 : i64, tpu.core_type = #tpu.core_type<tc>, window_params = [{transform_indices = @transform_0, window_bounds = array<i64: 8, 8, 32>}, {transform_indices = @transform_1, window_bounds = array<i64: 8, 8, 32>}, {pipeline_mode = #tpu.pipeline_mode<synchronous>, transform_indices = @transform_2, window_bounds = array<i64: 32, 32>}, {pipeline_mode = #tpu.pipeline_mode<synchronous>, transform_indices = @transform_3, window_bounds = array<i64: 1, 32>}, {pipeline_mode = #tpu.pipeline_mode<synchronous>, transform_indices = @transform_4, window_bounds = array<i64: 32, 32>}, {pipeline_mode = #tpu.pipeline_mode<synchronous>, transform_indices = @transform_5, window_bounds = array<i64: 1, 32>}, {pipeline_mode = #tpu.pipeline_mode<synchronous>, transform_indices = @transform_6, window_bounds = array<i64: 32, 32>}, {pipeline_mode = #tpu.pipeline_mode<synchronous>, transform_indices = @transform_7, window_bounds = array<i64: 32, 32>}, {pipeline_mode = #tpu.pipeline_mode<synchronous>, transform_indices = @transform_8, window_bounds = array<i64: 1, 32>}, {pipeline_mode = #tpu.pipeline_mode<synchronous>, transform_indices = @transform_9, window_bounds = array<i64: 32, 32>}, {pipeline_mode = #tpu.pipeline_mode<synchronous>, transform_indices = @transform_10, window_bounds = array<i64: 1, 32>}, {pipeline_mode = #tpu.pipeline_mode<synchronous>, transform_indices = @transform_11, window_bounds = array<i64: 32, 32>}, {pipeline_mode = #tpu.pipeline_mode<synchronous>, transform_indices = @transform_12, window_bounds = array<i64: 32, 32>}, {pipeline_mode = #tpu.pipeline_mode<synchronous>, transform_indices = @transform_13, window_bounds = array<i64: 1, 32>}, {pipeline_mode = #tpu.pipeline_mode<synchronous>, transform_indices = @transform_14, window_bounds = array<i64: 32, 32>}, {pipeline_mode = #tpu.pipeline_mode<synchronous>, transform_indices = @transform_15, window_bounds = array<i64: 1, 32>}, {pipeline_mode = #tpu.pipeline_mode<synchronous>, transform_indices = @transform_16, window_bounds = array<i64: 32, 4>}, {pipeline_mode = #tpu.pipeline_mode<synchronous>, transform_indices = @transform_17, window_bounds = array<i64: 1, 4>}, {transform_indices = @transform_18, window_bounds = array<i64: 8, 4>}]} {
    %c0 = arith.constant 0 : index
    %c0_0 = arith.constant 0 : index
    %c0_1 = arith.constant 0 : index
    %0 = vector.load %arg1[%c0, %c0_0, %c0_1] : memref<8x8x32xf32, #tpu.memory_space<vmem>>, vector<8x8x32xf32>
    %c0_2 = arith.constant 0 : index
    %c0_3 = arith.constant 0 : index
    %c0_4 = arith.constant 0 : index
    %1 = vector.load %arg2[%c0_2, %c0_3, %c0_4] : memref<8x8x32xf32, #tpu.memory_space<vmem>>, vector<8x8x32xf32>
    %2 = vector.shape_cast %0 : vector<8x8x32xf32> to vector<64x32xf32>
    %c0_5 = arith.constant 0 : index
    %c0_6 = arith.constant 0 : index
    %3 = vector.load %arg20[%c0_5, %c0_6] : memref<128x32xf32, #tpu.memory_space<vmem>>, vector<64x32xf32>
    tpu.vector_store %arg20[%c0_5, %c0_6], %2 {strides = array<i32>} : memref<128x32xf32, #tpu.memory_space<vmem>>, vector<64x32xf32>,
    %4 = vector.shape_cast %1 : vector<8x8x32xf32> to vector<64x32xf32>
    %c64 = arith.constant 64 : index
    %c0_7 = arith.constant 0 : index
    %5 = vector.load %arg20[%c64, %c0_7] : memref<128x32xf32, #tpu.memory_space<vmem>>, vector<64x32xf32>
    tpu.vector_store %arg20[%c64, %c0_7], %4 {strides = array<i32>} : memref<128x32xf32, #tpu.memory_space<vmem>>, vector<64x32xf32>,
    %c0_8 = arith.constant 0 : index
    %c0_9 = arith.constant 0 : index
    %6 = vector.load %arg20[%c0_8, %c0_9] : memref<128x32xf32, #tpu.memory_space<vmem>>, vector<128x32xf32>
    %7 = arith.truncf %6 : vector<128x32xf32> to vector<128x32xbf16>
    %c0_10 = arith.constant 0 : index
    %c0_11 = arith.constant 0 : index
    %8 = vector.load %arg3[%c0_10, %c0_11] : memref<32x32xf32, #tpu.memory_space<vmem>>, vector<32x32xf32>
    %9 = arith.truncf %8 : vector<32x32xf32> to vector<32x32xbf16>
    %cst = arith.constant dense<0.000000e+00> : vector<128x32xf32>
    %10 = tpu.matmul %7, %9, %cst {dimension_numbers = #tpu.dot_dimension_numbers<[1], [0], [0], [1], [0, 0, 1, 1], [], []>} : vector<128x32xbf16>, vector<32x32xbf16>, vector<128x32xf32> -> vector<128x32xf32>
    %c0_12 = arith.constant 0 : index
    %c0_13 = arith.constant 0 : index
    %11 = vector.load %arg4[%c0_12, %c0_13] : memref<1x32xf32, #tpu.memory_space<vmem>>, vector<1x32xf32>
    %12 = vector.broadcast %11 : vector<1x32xf32> to vector<128x32xf32>
    %13 = arith.addf %10, %12 : vector<128x32xf32>
    %cst_14 = arith.constant 0.000000e+00 : f32
    %14 = vector.broadcast %cst_14 : f32 to vector<128x32xf32>
    %15 = arith.maximumf %13, %14 : vector<128x32xf32>
    %16 = arith.truncf %15 : vector<128x32xf32> to vector<128x32xbf16>
    %c0_15 = arith.constant 0 : index
    %c0_16 = arith.constant 0 : index
    %17 = vector.load %arg5[%c0_15, %c0_16] : memref<32x32xf32, #tpu.memory_space<vmem>>, vector<32x32xf32>
    %18 = arith.truncf %17 : vector<32x32xf32> to vector<32x32xbf16>
    %cst_17 = arith.constant dense<0.000000e+00> : vector<128x32xf32>
    %19 = tpu.matmul %16, %18, %cst_17 {dimension_numbers = #tpu.dot_dimension_numbers<[1], [0], [0], [1], [0, 0, 1, 1], [], []>} : vector<128x32xbf16>, vector<32x32xbf16>, vector<128x32xf32> -> vector<128x32xf32>
    %c0_18 = arith.constant 0 : index
    %c0_19 = arith.constant 0 : index
    %20 = vector.load %arg6[%c0_18, %c0_19] : memref<1x32xf32, #tpu.memory_space<vmem>>, vector<1x32xf32>
    %21 = vector.broadcast %20 : vector<1x32xf32> to vector<128x32xf32>
    %22 = arith.addf %19, %21 : vector<128x32xf32>
    %cst_20 = arith.constant 0.000000e+00 : f32
    %23 = vector.broadcast %cst_20 : f32 to vector<128x32xf32>
    %24 = arith.maximumf %22, %23 : vector<128x32xf32>
    %25 = vector.extract_strided_slice %24 {offsets = [0, 0], sizes = [64, 32], strides = [1, 1]} : vector<128x32xf32> to vector<64x32xf32>
    %26 = vector.shape_cast %25 : vector<64x32xf32> to vector<8x8x32xf32>
    %27 = arith.truncf %26 : vector<8x8x32xf32> to vector<8x8x32xbf16>
    %28 = vector.extract_strided_slice %24 {offsets = [64, 0], sizes = [64, 32], strides = [1, 1]} : vector<128x32xf32> to vector<64x32xf32>
    %29 = vector.shape_cast %28 : vector<64x32xf32> to vector<8x8x32xf32>
    %30 = arith.truncf %29 : vector<8x8x32xf32> to vector<8x8x32xbf16>
    %cst_21 = arith.constant dense<0.000000e+00> : vector<8x8x8xf32>
    %31 = tpu.matmul %27, %30, %cst_21 {dimension_numbers = #tpu.dot_dimension_numbers<[2], [2], [1], [1], [0, 0, 0, 1, 1, 1], [0], [0]>} : vector<8x8x32xbf16>, vector<8x8x32xbf16>, vector<8x8x8xf32> -> vector<8x8x8xf32>
    %cst_22 = arith.constant dense<0.000000e+00> : vector<8x8x8xf32>
    %32 = tpu.matmul %30, %27, %cst_22 {dimension_numbers = #tpu.dot_dimension_numbers<[2], [2], [1], [1], [0, 0, 0, 1, 1, 1], [0], [0]>} : vector<8x8x32xbf16>, vector<8x8x32xbf16>, vector<8x8x8xf32> -> vector<8x8x8xf32>
    %cst_23 = arith.constant dense<0xFF800000> : vector<8x8xf32>
    %33 = vector.multi_reduction <maximumf>, %31, %cst_23 [2] : vector<8x8x8xf32> to vector<8x8xf32>
    %34 = vector.shape_cast %33 : vector<8x8xf32> to vector<8x8x1xf32>
    %35 = vector.broadcast %34 : vector<8x8x1xf32> to vector<8x8x8xf32>
    %36 = arith.subf %31, %35 : vector<8x8x8xf32>
    %37 = math.exp %36 : vector<8x8x8xf32>
    %cst_24 = arith.constant dense<0.000000e+00> : vector<8x8xf32>
    %38 = vector.multi_reduction <add>, %37, %cst_24 [2] : vector<8x8x8xf32> to vector<8x8xf32>
    %39 = vector.shape_cast %38 : vector<8x8xf32> to vector<8x8x1xf32>
    %40 = tpu.reciprocal %39 {approx = true} : vector<8x8x1xf32> -> vector<8x8x1xf32>
    %41 = vector.broadcast %40 : vector<8x8x1xf32> to vector<8x8x8xf32>
    %42 = arith.mulf %37, %41 : vector<8x8x8xf32>
    %cst_25 = arith.constant dense<0xFF800000> : vector<8x8xf32>
    %43 = vector.multi_reduction <maximumf>, %32, %cst_25 [2] : vector<8x8x8xf32> to vector<8x8xf32>
    %44 = vector.shape_cast %43 : vector<8x8xf32> to vector<8x8x1xf32>
    %45 = vector.broadcast %44 : vector<8x8x1xf32> to vector<8x8x8xf32>
    %46 = arith.subf %32, %45 : vector<8x8x8xf32>
    %47 = math.exp %46 : vector<8x8x8xf32>
    %cst_26 = arith.constant dense<0.000000e+00> : vector<8x8xf32>
    %48 = vector.multi_reduction <add>, %47, %cst_26 [2] : vector<8x8x8xf32> to vector<8x8xf32>
    %49 = vector.shape_cast %48 : vector<8x8xf32> to vector<8x8x1xf32>
    %50 = tpu.reciprocal %49 {approx = true} : vector<8x8x1xf32> -> vector<8x8x1xf32>
    %51 = vector.broadcast %50 : vector<8x8x1xf32> to vector<8x8x8xf32>
    %52 = arith.mulf %47, %51 : vector<8x8x8xf32>
    %53 = arith.truncf %42 : vector<8x8x8xf32> to vector<8x8x8xbf16>
    %54 = arith.truncf %1 : vector<8x8x32xf32> to vector<8x8x32xbf16>
    %cst_27 = arith.constant dense<0.000000e+00> : vector<8x8x32xf32>
    %55 = tpu.matmul %53, %54, %cst_27 {dimension_numbers = #tpu.dot_dimension_numbers<[2], [1], [1], [2], [0, 0, 0, 1, 1, 2], [0], [0]>} : vector<8x8x8xbf16>, vector<8x8x32xbf16>, vector<8x8x32xf32> -> vector<8x8x32xf32>
    %56 = arith.truncf %52 : vector<8x8x8xf32> to vector<8x8x8xbf16>
    %57 = arith.truncf %0 : vector<8x8x32xf32> to vector<8x8x32xbf16>
    %cst_28 = arith.constant dense<0.000000e+00> : vector<8x8x32xf32>
    %58 = tpu.matmul %56, %57, %cst_28 {dimension_numbers = #tpu.dot_dimension_numbers<[2], [1], [1], [2], [0, 0, 0, 1, 1, 2], [0], [0]>} : vector<8x8x8xbf16>, vector<8x8x32xbf16>, vector<8x8x32xf32> -> vector<8x8x32xf32>
    %59 = vector.shape_cast %55 : vector<8x8x32xf32> to vector<64x32xf32>
    %c0_29 = arith.constant 0 : index
    %c0_30 = arith.constant 0 : index
    %60 = vector.load %arg21[%c0_29, %c0_30] : memref<128x32xf32, #tpu.memory_space<vmem>>, vector<64x32xf32>
    tpu.vector_store %arg21[%c0_29, %c0_30], %59 {strides = array<i32>} : memref<128x32xf32, #tpu.memory_space<vmem>>, vector<64x32xf32>,
    %61 = vector.shape_cast %58 : vector<8x8x32xf32> to vector<64x32xf32>
    %c64_31 = arith.constant 64 : index
    %c0_32 = arith.constant 0 : index
    %62 = vector.load %arg21[%c64_31, %c0_32] : memref<128x32xf32, #tpu.memory_space<vmem>>, vector<64x32xf32>
    tpu.vector_store %arg21[%c64_31, %c0_32], %61 {strides = array<i32>} : memref<128x32xf32, #tpu.memory_space<vmem>>, vector<64x32xf32>,
    %c0_33 = arith.constant 0 : index
    %c0_34 = arith.constant 0 : index
    %63 = vector.load %arg21[%c0_33, %c0_34] : memref<128x32xf32, #tpu.memory_space<vmem>>, vector<128x32xf32>
    %64 = arith.truncf %63 : vector<128x32xf32> to vector<128x32xbf16>
    %c0_35 = arith.constant 0 : index
    %c0_36 = arith.constant 0 : index
    %65 = vector.load %arg7[%c0_35, %c0_36] : memref<32x32xf32, #tpu.memory_space<vmem>>, vector<32x32xf32>
    %66 = arith.truncf %65 : vector<32x32xf32> to vector<32x32xbf16>
    %cst_37 = arith.constant dense<0.000000e+00> : vector<128x32xf32>
    %67 = tpu.matmul %7, %66, %cst_37 {dimension_numbers = #tpu.dot_dimension_numbers<[1], [0], [0], [1], [0, 0, 1, 1], [], []>} : vector<128x32xbf16>, vector<32x32xbf16>, vector<128x32xf32> -> vector<128x32xf32>
    %c0_38 = arith.constant 0 : index
    %c0_39 = arith.constant 0 : index
    %68 = vector.load %arg8[%c0_38, %c0_39] : memref<32x32xf32, #tpu.memory_space<vmem>>, vector<32x32xf32>
    %69 = arith.truncf %68 : vector<32x32xf32> to vector<32x32xbf16>
    %cst_40 = arith.constant dense<0.000000e+00> : vector<128x32xf32>
    %70 = tpu.matmul %64, %69, %cst_40 {dimension_numbers = #tpu.dot_dimension_numbers<[1], [0], [0], [1], [0, 0, 1, 1], [], []>} : vector<128x32xbf16>, vector<32x32xbf16>, vector<128x32xf32> -> vector<128x32xf32>
    %71 = arith.addf %67, %70 : vector<128x32xf32>
    %c0_41 = arith.constant 0 : index
    %c0_42 = arith.constant 0 : index
    %72 = vector.load %arg9[%c0_41, %c0_42] : memref<1x32xf32, #tpu.memory_space<vmem>>, vector<1x32xf32>
    %73 = vector.broadcast %72 : vector<1x32xf32> to vector<128x32xf32>
    %74 = arith.addf %71, %73 : vector<128x32xf32>
    %cst_43 = arith.constant 0.000000e+00 : f32
    %75 = vector.broadcast %cst_43 : f32 to vector<128x32xf32>
    %76 = arith.maximumf %74, %75 : vector<128x32xf32>
    %77 = arith.truncf %76 : vector<128x32xf32> to vector<128x32xbf16>
    %c0_44 = arith.constant 0 : index
    %c0_45 = arith.constant 0 : index
    %78 = vector.load %arg10[%c0_44, %c0_45] : memref<32x32xf32, #tpu.memory_space<vmem>>, vector<32x32xf32>
    %79 = arith.truncf %78 : vector<32x32xf32> to vector<32x32xbf16>
    %cst_46 = arith.constant dense<0.000000e+00> : vector<128x32xf32>
    %80 = tpu.matmul %77, %79, %cst_46 {dimension_numbers = #tpu.dot_dimension_numbers<[1], [0], [0], [1], [0, 0, 1, 1], [], []>} : vector<128x32xbf16>, vector<32x32xbf16>, vector<128x32xf32> -> vector<128x32xf32>
    %c0_47 = arith.constant 0 : index
    %c0_48 = arith.constant 0 : index
    %81 = vector.load %arg11[%c0_47, %c0_48] : memref<1x32xf32, #tpu.memory_space<vmem>>, vector<1x32xf32>
    %82 = vector.broadcast %81 : vector<1x32xf32> to vector<128x32xf32>
    %83 = arith.addf %80, %82 : vector<128x32xf32>
    %cst_49 = arith.constant 0.000000e+00 : f32
    %84 = vector.broadcast %cst_49 : f32 to vector<128x32xf32>
    %85 = arith.maximumf %83, %84 : vector<128x32xf32>
    %86 = vector.extract_strided_slice %85 {offsets = [0, 0], sizes = [64, 32], strides = [1, 1]} : vector<128x32xf32> to vector<64x32xf32>
    %87 = vector.shape_cast %86 : vector<64x32xf32> to vector<8x8x32xf32>
    %cst_50 = arith.constant dense<0.000000e+00> : vector<8x32xf32>
    %88 = vector.multi_reduction <add>, %87, %cst_50 [1] : vector<8x8x32xf32> to vector<8x32xf32>
    %89 = vector.extract_strided_slice %85 {offsets = [64, 0], sizes = [64, 32], strides = [1, 1]} : vector<128x32xf32> to vector<64x32xf32>
    %90 = vector.shape_cast %89 : vector<64x32xf32> to vector<8x8x32xf32>
    %cst_51 = arith.constant dense<0.000000e+00> : vector<8x32xf32>
    %91 = vector.multi_reduction <add>, %90, %cst_51 [1] : vector<8x8x32xf32> to vector<8x32xf32>
    %c0_52 = arith.constant 0 : index
    %c0_53 = arith.constant 0 : index
    %92 = vector.load %arg12[%c0_52, %c0_53] : memref<32x32xf32, #tpu.memory_space<vmem>>, vector<32x32xf32>
    %cst_54 = arith.constant dense<0.000000e+00> : vector<8x32xf32>
    %93 = tpu.matmul %88, %92, %cst_54 {dimension_numbers = #tpu.dot_dimension_numbers<[1], [0], [0], [1], [0, 0, 1, 1], [], []>} : vector<8x32xf32>, vector<32x32xf32>, vector<8x32xf32> -> vector<8x32xf32>
    %c0_55 = arith.constant 0 : index
    %c0_56 = arith.constant 0 : index
    %94 = vector.load %arg13[%c0_55, %c0_56] : memref<32x32xf32, #tpu.memory_space<vmem>>, vector<32x32xf32>
    %cst_57 = arith.constant dense<0.000000e+00> : vector<8x32xf32>
    %95 = tpu.matmul %91, %94, %cst_57 {dimension_numbers = #tpu.dot_dimension_numbers<[1], [0], [0], [1], [0, 0, 1, 1], [], []>} : vector<8x32xf32>, vector<32x32xf32>, vector<8x32xf32> -> vector<8x32xf32>
    %96 = arith.addf %93, %95 : vector<8x32xf32>
    %c0_58 = arith.constant 0 : index
    %c0_59 = arith.constant 0 : index
    %97 = vector.load %arg14[%c0_58, %c0_59] : memref<1x32xf32, #tpu.memory_space<vmem>>, vector<1x32xf32>
    %98 = vector.broadcast %97 : vector<1x32xf32> to vector<8x32xf32>
    %99 = arith.addf %96, %98 : vector<8x32xf32>
    %cst_60 = arith.constant 0.000000e+00 : f32
    %100 = vector.broadcast %cst_60 : f32 to vector<8x32xf32>
    %101 = arith.maximumf %99, %100 : vector<8x32xf32>
    %c0_61 = arith.constant 0 : index
    %c0_62 = arith.constant 0 : index
    %102 = vector.load %arg15[%c0_61, %c0_62] : memref<32x32xf32, #tpu.memory_space<vmem>>, vector<32x32xf32>
    %cst_63 = arith.constant dense<0.000000e+00> : vector<8x32xf32>
    %103 = tpu.matmul %101, %102, %cst_63 {dimension_numbers = #tpu.dot_dimension_numbers<[1], [0], [0], [1], [0, 0, 1, 1], [], []>} : vector<8x32xf32>, vector<32x32xf32>, vector<8x32xf32> -> vector<8x32xf32>
    %c0_64 = arith.constant 0 : index
    %c0_65 = arith.constant 0 : index
    %104 = vector.load %arg16[%c0_64, %c0_65] : memref<1x32xf32, #tpu.memory_space<vmem>>, vector<1x32xf32>
    %105 = vector.broadcast %104 : vector<1x32xf32> to vector<8x32xf32>
    %106 = arith.addf %103, %105 : vector<8x32xf32>
    %cst_66 = arith.constant 0.000000e+00 : f32
    %107 = vector.broadcast %cst_66 : f32 to vector<8x32xf32>
    %108 = arith.maximumf %106, %107 : vector<8x32xf32>
    %c0_67 = arith.constant 0 : index
    %c0_68 = arith.constant 0 : index
    %109 = vector.load %arg17[%c0_67, %c0_68] : memref<32x4xf32, #tpu.memory_space<vmem>>, vector<32x4xf32>
    %cst_69 = arith.constant dense<0.000000e+00> : vector<8x4xf32>
    %110 = tpu.matmul %108, %109, %cst_69 {dimension_numbers = #tpu.dot_dimension_numbers<[1], [0], [0], [1], [0, 0, 1, 1], [], []>} : vector<8x32xf32>, vector<32x4xf32>, vector<8x4xf32> -> vector<8x4xf32>
    %c0_70 = arith.constant 0 : index
    %c0_71 = arith.constant 0 : index
    %111 = vector.load %arg18[%c0_70, %c0_71] : memref<1x4xf32, #tpu.memory_space<vmem>>, vector<1x4xf32>
    %112 = vector.broadcast %111 : vector<1x4xf32> to vector<8x4xf32>
    %113 = arith.addf %110, %112 : vector<8x4xf32>
    %cst_72 = arith.constant dense<0xFF800000> : vector<8xf32>
    %114 = vector.multi_reduction <maximumf>, %113, %cst_72 [1] : vector<8x4xf32> to vector<8xf32>
    %115 = vector.shape_cast %114 : vector<8xf32> to vector<8x1xf32>
    %116 = vector.broadcast %115 : vector<8x1xf32> to vector<8x4xf32>
    %117 = arith.subf %113, %116 : vector<8x4xf32>
    %118 = vector.broadcast %115 : vector<8x1xf32> to vector<8x4xf32>
    %119 = arith.subf %113, %118 : vector<8x4xf32>
    %120 = math.exp %119 : vector<8x4xf32>
    %cst_73 = arith.constant dense<0.000000e+00> : vector<8xf32>
    %121 = vector.multi_reduction <add>, %120, %cst_73 [1] : vector<8x4xf32> to vector<8xf32>
    %122 = vector.shape_cast %121 : vector<8xf32> to vector<8x1xf32>
    %123 = math.log %122 : vector<8x1xf32>
    %124 = vector.broadcast %123 : vector<8x1xf32> to vector<8x4xf32>
    %125 = arith.subf %117, %124 : vector<8x4xf32>
    %c0_74 = arith.constant 0 : index
    %c0_75 = arith.constant 0 : index
    %126 = vector.load %arg19[%c0_74, %c0_75] : memref<8x4xf32, #tpu.memory_space<vmem>>, vector<8x4xf32>
    tpu.vector_store %arg19[%c0_74, %c0_75], %125 {strides = array<i32>} : memref<8x4xf32, #tpu.memory_space<vmem>>, vector<8x4xf32>,
    return
  }
  func.func @transform_0(%arg0: i32) -> (i32, i32, i32) {
    %c0_i32 = arith.constant 0 : i32
    %c0_i32_0 = arith.constant 0 : i32
    %c0_i32_1 = arith.constant 0 : i32
    return %arg0, %c0_i32, %c0_i32_0 : i32, i32, i32
  }
  func.func @transform_1(%arg0: i32) -> (i32, i32, i32) {
    %c0_i32 = arith.constant 0 : i32
    %c0_i32_0 = arith.constant 0 : i32
    %c0_i32_1 = arith.constant 0 : i32
    return %arg0, %c0_i32, %c0_i32_0 : i32, i32, i32
  }
  func.func @transform_2(%arg0: i32) -> (i32, i32) {
    %c0_i32 = arith.constant 0 : i32
    %c0_i32_0 = arith.constant 0 : i32
    %c0_i32_1 = arith.constant 0 : i32
    return %c0_i32, %c0_i32_0 : i32, i32
  }
  func.func @transform_3(%arg0: i32) -> (i32, i32) {
    %c0_i32 = arith.constant 0 : i32
    %c0_i32_0 = arith.constant 0 : i32
    %c0_i32_1 = arith.constant 0 : i32
    return %c0_i32, %c0_i32_0 : i32, i32
  }
  func.func @transform_4(%arg0: i32) -> (i32, i32) {
    %c0_i32 = arith.constant 0 : i32
    %c0_i32_0 = arith.constant 0 : i32
    %c0_i32_1 = arith.constant 0 : i32
    return %c0_i32, %c0_i32_0 : i32, i32
  }
  func.func @transform_5(%arg0: i32) -> (i32, i32) {
    %c0_i32 = arith.constant 0 : i32
    %c0_i32_0 = arith.constant 0 : i32
    %c0_i32_1 = arith.constant 0 : i32
    return %c0_i32, %c0_i32_0 : i32, i32
  }
  func.func @transform_6(%arg0: i32) -> (i32, i32) {
    %c0_i32 = arith.constant 0 : i32
    %c0_i32_0 = arith.constant 0 : i32
    %c0_i32_1 = arith.constant 0 : i32
    return %c0_i32, %c0_i32_0 : i32, i32
  }
  func.func @transform_7(%arg0: i32) -> (i32, i32) {
    %c0_i32 = arith.constant 0 : i32
    %c0_i32_0 = arith.constant 0 : i32
    %c0_i32_1 = arith.constant 0 : i32
    return %c0_i32, %c0_i32_0 : i32, i32
  }
  func.func @transform_8(%arg0: i32) -> (i32, i32) {
    %c0_i32 = arith.constant 0 : i32
    %c0_i32_0 = arith.constant 0 : i32
    %c0_i32_1 = arith.constant 0 : i32
    return %c0_i32, %c0_i32_0 : i32, i32
  }
  func.func @transform_9(%arg0: i32) -> (i32, i32) {
    %c0_i32 = arith.constant 0 : i32
    %c0_i32_0 = arith.constant 0 : i32
    %c0_i32_1 = arith.constant 0 : i32
    return %c0_i32, %c0_i32_0 : i32, i32
  }
  func.func @transform_10(%arg0: i32) -> (i32, i32) {
    %c0_i32 = arith.constant 0 : i32
    %c0_i32_0 = arith.constant 0 : i32
    %c0_i32_1 = arith.constant 0 : i32
    return %c0_i32, %c0_i32_0 : i32, i32
  }
  func.func @transform_11(%arg0: i32) -> (i32, i32) {
    %c0_i32 = arith.constant 0 : i32
    %c0_i32_0 = arith.constant 0 : i32
    %c0_i32_1 = arith.constant 0 : i32
    return %c0_i32, %c0_i32_0 : i32, i32
  }
  func.func @transform_12(%arg0: i32) -> (i32, i32) {
    %c0_i32 = arith.constant 0 : i32
    %c0_i32_0 = arith.constant 0 : i32
    %c0_i32_1 = arith.constant 0 : i32
    return %c0_i32, %c0_i32_0 : i32, i32
  }
  func.func @transform_13(%arg0: i32) -> (i32, i32) {
    %c0_i32 = arith.constant 0 : i32
    %c0_i32_0 = arith.constant 0 : i32
    %c0_i32_1 = arith.constant 0 : i32
    return %c0_i32, %c0_i32_0 : i32, i32
  }
  func.func @transform_14(%arg0: i32) -> (i32, i32) {
    %c0_i32 = arith.constant 0 : i32
    %c0_i32_0 = arith.constant 0 : i32
    %c0_i32_1 = arith.constant 0 : i32
    return %c0_i32, %c0_i32_0 : i32, i32
  }
  func.func @transform_15(%arg0: i32) -> (i32, i32) {
    %c0_i32 = arith.constant 0 : i32
    %c0_i32_0 = arith.constant 0 : i32
    %c0_i32_1 = arith.constant 0 : i32
    return %c0_i32, %c0_i32_0 : i32, i32
  }
  func.func @transform_16(%arg0: i32) -> (i32, i32) {
    %c0_i32 = arith.constant 0 : i32
    %c0_i32_0 = arith.constant 0 : i32
    %c0_i32_1 = arith.constant 0 : i32
    return %c0_i32, %c0_i32_0 : i32, i32
  }
  func.func @transform_17(%arg0: i32) -> (i32, i32) {
    %c0_i32 = arith.constant 0 : i32
    %c0_i32_0 = arith.constant 0 : i32
    %c0_i32_1 = arith.constant 0 : i32
    return %c0_i32, %c0_i32_0 : i32, i32
  }
  func.func @transform_18(%arg0: i32) -> (i32, i32) {
    %c0_i32 = arith.constant 0 : i32
    %c0_i32_0 = arith.constant 0 : i32
    return %arg0, %c0_i32 : i32, i32
  }
}

</mosaic_0001>

<bundles_post_ra>
// kernel: tpu_custom_call.1
= control target key start
LH: loop header
LB: loop body
LE: loop exit
PB: predicated region body
PF: predicated region fallthrough
CT: control target
= control target key end

     0   :  { %s4999_s0 = inlined_call_operand.hbm [shape: f32[8,8,32], index: 0, kind: input, shape index: {}]   ;;  %s5000_s1 = inlined_call_operand.hbm [shape: f32[8,8,32], index: 1, kind: input, shape index: {}]   ;;  %s5001_s2 = inlined_call_operand.vmem [shape: f32[32,32], index: 2, kind: input, shape index: {}]   ;;  %s5002_s3 = inlined_call_operand.vmem [shape: f32[1,32], index: 3, kind: input, shape index: {}]   ;;  %s5003_s4 = inlined_call_operand.hbm [shape: f32[32,32], index: 4, kind: input, shape index: {}]   ;;  %s5004_s5 = inlined_call_operand.vmem [shape: f32[1,32], index: 5, kind: input, shape index: {}]   ;;  %s5005_s6 = inlined_call_operand.hbm [shape: f32[32,32], index: 6, kind: input, shape index: {}]   ;;  %s5006_s7 = inlined_call_operand.hbm [shape: f32[32,32], index: 7, kind: input, shape index: {}]   ;;  %s5007_s8 = inlined_call_operand.hbm [shape: f32[1,32], index: 8, kind: input, shape index: {}]   ;;  %s5008_s9 = inlined_call_operand.vmem [shape: f32[32,32], index: 9, kind: input, shape index: {}]   ;;  %s5009_s10 = inlined_call_operand.vmem [shape: f32[1,32], index: 10, kind: input, shape index: {}]   ;;  %s5010_s11 = inlined_call_operand.hbm [shape: f32[32,32], index: 11, kind: input, shape index: {}]   ;;  %s5011_s12 = inlined_call_operand.hbm [shape: f32[32,32], index: 12, kind: input, shape index: {}]   ;;  %s5012_s13 = inlined_call_operand.vmem [shape: f32[1,32], index: 13, kind: input, shape index: {}]   ;;  %s5013_s14 = inlined_call_operand.hbm [shape: f32[32,32], index: 14, kind: input, shape index: {}]   ;;  %s5014_s15 = inlined_call_operand.vmem [shape: f32[1,32], index: 15, kind: input, shape index: {}]   ;;  %s5015_s16 = inlined_call_operand.vmem [shape: f32[32,4], index: 16, kind: input, shape index: {}]   ;;  %s5016_s17 = inlined_call_operand.vmem [shape: f32[1,4], index: 17, kind: input, shape index: {}]   ;;  %s5017_s18 = inlined_call_operand.vmem [shape: f32[8,4], index: 18, kind: output, shape index: {}]  }
   0x1   :  { %5021 = sst [smem:[#allocation23_spill]] %s4999_s0 }
   0x2   :  { %5022 = sst [smem:[#allocation24_spill]] %s5000_s1 }
   0x3   :  { %5023 = sst [smem:[#allocation25_spill]] %s5001_s2 }
   0x4   :  { %5024 = sst [smem:[#allocation26_spill]] %s5017_s18 }
   0x5   :  { %23 = vsyncpa [#allocation5], 0 }
   0x6   :  { %24 = vsyncpa [#allocation7], 0 }
   0x7   :  { %25 = vsyncpa [#allocation10], 0 }
   0x8   :  { %26 = vsyncpa [#allocation13], 0 }
   0x9   :  { %27 = vsyncpa [#allocation16], 0  ;;  %s4047_s27 = smov [#allocation6]   ;;  %s4048_s29 = smov [#allocation9]  }
   0xa   :  { %s45_s28 = sshll.u32 %s4047_s27, 4  ;;  %s75_s30 = sshll.u32 %s4048_s29, 4  ;;  %s46_s28 = int_to_ptr.vmem [resolvable:$true] %s45_s28  ;;  %s4156_s30 = int_to_ptr.vmem [resolvable:$true] %s75_s30 }
   0xb   :  { %s5025_s1 = sld [smem:[#allocation24_spill]] }
  0x11   :  { %s3839_s20 = scalar_lea.hbm %s5025_s1, 1024 }
  0x12   :  { %p3840_p0 = scmp.ne.s32.totalorder %s5025_s1, %s3839_s20  ;;  %p3843_p1 = scmp.lt.u32.totalorder %s3839_s20, %s5025_s1 }
  0x14   :  { %p3845_p2 = pnand %p3843_p1, %p3840_p0 }
  0x16   :  { %3848 = shalt.err (!%p3845_p2)
}
  0x17   :  { %s3849_s24 = scalar_lea.vmem %s46_s28, 1024  ;;  %p3854_p4 = scmp.lt.s32.totalorder %s46_s28, %s46_s28 }
  0x18   :  { %p3850_p3 = scmp.ne.s32.totalorder %s46_s28, %s3849_s24  ;;  %p3855_p5 = scmp.lt.s32.totalorder %s3849_s24, %s3849_s24 }
  0x1a   :  { %p3856_p6 = por %p3855_p5, %p3854_p4 }
  0x1c   :  { %p3857_p7 = pnand %p3856_p6, %p3850_p3 }
  0x1e   :  { %3860 = shalt.err (!%p3857_p7)
}
  0x1f   :  { %s4049_s25 = smov 128   ;;  %s4050_s26 = smov 8  }
  0x20   :  { %51 = dma.hbm_to_vmem [thread:$0]  %s5025_s1, 1024, %s46_s28, [#allocation7], %s4049_s25, %s4049_s25, %s4050_s26  }
  0x21   :  { %s3861_s20 = scalar_lea.hbm %s5005_s6, 512 }
  0x22   :  { %p3862_p8 = scmp.ne.s32.totalorder %s5005_s6, %s3861_s20  ;;  %p3865_p9 = scmp.lt.u32.totalorder %s3861_s20, %s5005_s6 }
  0x24   :  { %p3867_p10 = pnand %p3865_p9, %p3862_p8 }
  0x26   :  { %3870 = shalt.err (!%p3867_p10)
}
  0x27   :  { %s3871_s24 = scalar_lea.vmem %s4156_s30, 512  ;;  %p3876_p12 = scmp.lt.s32.totalorder %s4156_s30, %s4156_s30 }
  0x28   :  { %p3872_p11 = scmp.ne.s32.totalorder %s4156_s30, %s3871_s24  ;;  %p3877_p13 = scmp.lt.s32.totalorder %s3871_s24, %s3871_s24 }
  0x2a   :  { %p3878_p0 = por %p3877_p13, %p3876_p12 }
  0x2c   :  { %p3879_p1 = pnand %p3878_p0, %p3872_p11 }
  0x2e   :  { %3882 = shalt.err (!%p3879_p1)
}
  0x2f   :  { %81 = dma.hbm_to_vmem [thread:$0]  %s5005_s6, 512, %s4156_s30, [#allocation10], %s4049_s25, %s4049_s25, %s4050_s26  }
  0x30   :  { %s4051_s27 = smov [#allocation12]   ;;  %s4052_s0 = smov [#allocation15]  }
  0x31   :  { %s100_s29 = sshll.u32 %s4051_s27, 4  ;;  %s125_s19 = sshll.u32 %s4052_s0, 4  ;;  %s101_s29 = int_to_ptr.vmem [resolvable:$true] %s100_s29  ;;  %s4193_s19 = int_to_ptr.vmem [resolvable:$true] %s125_s19 }
  0x32   :  { %s3883_s22 = scalar_lea.hbm %s5007_s8, 16 }
  0x33   :  { %p3884_p2 = scmp.ne.s32.totalorder %s5007_s8, %s3883_s22  ;;  %p3887_p3 = scmp.lt.u32.totalorder %s3883_s22, %s5007_s8 }
  0x35   :  { %p3889_p4 = pnand %p3887_p3, %p3884_p2 }
  0x37   :  { %3892 = shalt.err (!%p3889_p4)
}
  0x38   :  { %s3893_s6 = scalar_lea.vmem %s101_s29, 16  ;;  %s3897_s30 = scalar_lea.vmem %s101_s29, 32 }
  0x39   :  { %p3894_p5 = scmp.ne.s32.totalorder %s101_s29, %s3893_s6  ;;  %p3898_p6 = scmp.lt.s32.totalorder %s101_s29, %s101_s29 }
  0x3a   :  { %p3899_p7 = scmp.lt.s32.totalorder %s3897_s30, %s3893_s6 }
  0x3c   :  { %p3900_p8 = por %p3899_p7, %p3898_p6 }
  0x3e   :  { %p3901_p9 = pnand %p3900_p8, %p3894_p5 }
  0x40   :  { %3904 = shalt.err (!%p3901_p9)
}
  0x41   :  { %103 = dma.hbm_to_vmem [thread:$0]  %s5007_s8, 16, %s101_s29, [#allocation13]  }
  0x42   :  { %s3905_s20 = scalar_lea.hbm %s5011_s12, 512 }
  0x43   :  { %p3906_p10 = scmp.ne.s32.totalorder %s5011_s12, %s3905_s20  ;;  %p3909_p11 = scmp.lt.u32.totalorder %s3905_s20, %s5011_s12 }
  0x45   :  { %p3911_p12 = pnand %p3909_p11, %p3906_p10 }
  0x47   :  { %3914 = shalt.err (!%p3911_p12)
}
  0x48   :  { %s3915_s23 = scalar_lea.vmem %s4193_s19, 512  ;;  %p3920_p0 = scmp.lt.s32.totalorder %s4193_s19, %s4193_s19 }
  0x49   :  { %p3916_p13 = scmp.ne.s32.totalorder %s4193_s19, %s3915_s23  ;;  %p3921_p1 = scmp.lt.s32.totalorder %s3915_s23, %s3915_s23 }
  0x4b   :  { %p3922_p2 = por %p3921_p1, %p3920_p0 }
  0x4d   :  { %p3923_p3 = pnand %p3922_p2, %p3916_p13 }
  0x4f   :  { %3926 = shalt.err (!%p3923_p3)
}
  0x50   :  { %131 = dma.hbm_to_vmem [thread:$0]  %s5011_s12, 512, %s4193_s19, [#allocation16], %s4049_s25, %s4049_s25, %s4050_s26  }
  0x51   :  { %s4053_s24 = smov [#allocation4]   ;;  %s4054_s30 = smov [#allocation8]  }
  0x52   :  { %s33_s6 = sshll.u32 %s4053_s24, 4  ;;  %s61_s28 = sshll.u32 %s4054_s30, 4  ;;  %s34_s6 = int_to_ptr.vmem [resolvable:$true] %s33_s6  ;;  %s4227_s28 = int_to_ptr.vmem [resolvable:$true] %s61_s28 }
  0x53   :  { %s5026_s0 = sld [smem:[#allocation23_spill]] }
  0x59   :  { %s3927_s20 = scalar_lea.hbm %s5026_s0, 1024 }
  0x5a   :  { %p3928_p4 = scmp.ne.s32.totalorder %s5026_s0, %s3927_s20  ;;  %p3931_p5 = scmp.lt.u32.totalorder %s3927_s20, %s5026_s0 }
  0x5c   :  { %p3933_p6 = pnand %p3931_p5, %p3928_p4 }
  0x5e   :  { %3936 = shalt.err (!%p3933_p6)
}
  0x5f   :  { %s3937_s12 = scalar_lea.vmem %s34_s6, 1024  ;;  %p3942_p8 = scmp.lt.s32.totalorder %s34_s6, %s34_s6 }
  0x60   :  { %p3938_p7 = scmp.ne.s32.totalorder %s34_s6, %s3937_s12  ;;  %p3943_p9 = scmp.lt.s32.totalorder %s3937_s12, %s3937_s12 }
  0x62   :  { %p3944_p10 = por %p3943_p9, %p3942_p8 }
  0x64   :  { %p3945_p11 = pnand %p3944_p10, %p3938_p7 }
  0x66   :  { %3948 = shalt.err (!%p3945_p11)
}
  0x67   :  { %39 = dma.hbm_to_vmem [thread:$0]  %s5026_s0, 1024, %s34_s6, [#allocation5], %s4049_s25, %s4049_s25, %s4050_s26  }
  0x68   :  { %s3949_s24 = scalar_lea.hbm %s5003_s4, 512 }
  0x69   :  { %p3950_p12 = scmp.ne.s32.totalorder %s5003_s4, %s3949_s24  ;;  %p3953_p13 = scmp.lt.u32.totalorder %s3949_s24, %s5003_s4 }
  0x6b   :  { %p3955_p0 = pnand %p3953_p13, %p3950_p12 }
  0x6d   :  { %3958 = shalt.err (!%p3955_p0)
}
  0x6e   :  { %s3959_s18 = scalar_lea.vmem %s4227_s28, 512  ;;  %p3964_p2 = scmp.lt.s32.totalorder %s4227_s28, %s4227_s28 }
  0x6f   :  { %p3960_p1 = scmp.ne.s32.totalorder %s4227_s28, %s3959_s18  ;;  %p3965_p3 = scmp.lt.s32.totalorder %s3959_s18, %s3959_s18 }
  0x71   :  { %p3966_p4 = por %p3965_p3, %p3964_p2 }
  0x73   :  { %p3967_p5 = pnand %p3966_p4, %p3960_p1 }
  0x75   :  { %3970 = shalt.err (!%p3967_p5)
}
  0x76   :  { %67 = dma.hbm_to_vmem [thread:$0]  %s5003_s4, 512, %s4227_s28, [#allocation7], %s4049_s25, %s4049_s25, %s4050_s26  }
  0x77   :  { %s4055_s21 = smov [#allocation11]   ;;  %s4056_s2 = smov [#allocation14]  }
  0x78   :  { %s87_s22 = sshll.u32 %s4055_s21, 4  ;;  %s113_s12 = sshll.u32 %s4056_s2, 4  ;;  %s88_s22 = int_to_ptr.vmem [resolvable:$true] %s87_s22  ;;  %s4264_s12 = int_to_ptr.vmem [resolvable:$true] %s113_s12 }
  0x79   :  { %s3971_s8 = scalar_lea.hbm %s5006_s7, 512 }
  0x7a   :  { %p3972_p6 = scmp.ne.s32.totalorder %s5006_s7, %s3971_s8  ;;  %p3975_p7 = scmp.lt.u32.totalorder %s3971_s8, %s5006_s7 }
  0x7c   :  { %p3977_p8 = pnand %p3975_p7, %p3972_p6 }
  0x7e   :  { %3980 = shalt.err (!%p3977_p8)
}
  0x7f   :  { %s3981_s4 = scalar_lea.vmem %s88_s22, 512  ;;  %p3986_p10 = scmp.lt.s32.totalorder %s88_s22, %s88_s22 }
  0x80   :  { %p3982_p9 = scmp.ne.s32.totalorder %s88_s22, %s3981_s4  ;;  %p3987_p11 = scmp.lt.s32.totalorder %s3981_s4, %s3981_s4 }
  0x82   :  { %p3988_p12 = por %p3987_p11, %p3986_p10 }
  0x84   :  { %p3989_p13 = pnand %p3988_p12, %p3982_p9 }
  0x86   :  { %3992 = shalt.err (!%p3989_p13)
}
  0x87   :  { %93 = dma.hbm_to_vmem [thread:$0]  %s5006_s7, 512, %s88_s22, [#allocation10], %s4049_s25, %s4049_s25, %s4050_s26  }
  0x88   :  { %s3993_s6 = scalar_lea.hbm %s5010_s11, 512 }
  0x89   :  { %p3994_p0 = scmp.ne.s32.totalorder %s5010_s11, %s3993_s6  ;;  %p3997_p1 = scmp.lt.u32.totalorder %s3993_s6, %s5010_s11 }
  0x8b   :  { %p3999_p2 = pnand %p3997_p1, %p3994_p0 }
  0x8d   :  { %4002 = shalt.err (!%p3999_p2)
}
  0x8e   :  { %s4003_s23 = scalar_lea.vmem %s4264_s12, 512  ;;  %p4008_p4 = scmp.lt.s32.totalorder %s4264_s12, %s4264_s12 }
  0x8f   :  { %p4004_p3 = scmp.ne.s32.totalorder %s4264_s12, %s4003_s23  ;;  %p4009_p5 = scmp.lt.s32.totalorder %s4003_s23, %s4003_s23 }
  0x91   :  { %p4010_p6 = por %p4009_p5, %p4008_p4 }
  0x93   :  { %p4011_p7 = pnand %p4010_p6, %p4004_p3 }
  0x95   :  { %4014 = shalt.err (!%p4011_p7)
}
  0x96   :  { %119 = dma.hbm_to_vmem [thread:$0]  %s5010_s11, 512, %s4264_s12, [#allocation13], %s4049_s25, %s4049_s25, %s4050_s26  }
  0x97   :  { %s4057_s8 = smov [#allocation17]   ;;  %s4015_s1 = scalar_lea.hbm %s5013_s14, 512 }
  0x98   :  { %s139_s29 = sshll.u32 %s4057_s8, 4  ;;  %p4016_p8 = scmp.ne.s32.totalorder %s5013_s14, %s4015_s1  ;;  %s140_s29 = int_to_ptr.vmem [resolvable:$true] %s139_s29 }
  0x99   :  { %p4019_p9 = scmp.lt.u32.totalorder %s4015_s1, %s5013_s14 }
  0x9b   :  { %p4021_p10 = pnand %p4019_p9, %p4016_p8 }
  0x9d   :  { %4024 = shalt.err (!%p4021_p10)
}
  0x9e   :  { %s4025_s18 = scalar_lea.vmem %s140_s29, 512  ;;  %p4030_p12 = scmp.lt.s32.totalorder %s140_s29, %s140_s29 }
  0x9f   :  { %p4026_p11 = scmp.ne.s32.totalorder %s140_s29, %s4025_s18  ;;  %p4031_p13 = scmp.lt.s32.totalorder %s4025_s18, %s4025_s18 }
  0xa1   :  { %p4032_p0 = por %p4031_p13, %p4030_p12 }
  0xa3   :  { %p4033_p1 = pnand %p4032_p0, %p4026_p11 }
  0xa5   :  { %4036 = shalt.err (!%p4033_p1)
}
  0xa6   :  { %145 = dma.hbm_to_vmem [thread:$0]  %s5013_s14, 512, %s140_s29, [#allocation16], %s4049_s25, %s4049_s25, %s4050_s26  }
  0xa7   :  { %4037 = dma.done.wait [#allocation5], 1024  }
  0xa8   :  { %4038 = vsyncadd [#allocation5], 4294966272 }
  0xa9   :  { %4039 = dma.done.wait [#allocation7], 1536  }
  0xaa   :  { %4040 = vsyncadd [#allocation7], 4294965760 }
  0xab   :  { %4041 = dma.done.wait [#allocation10], 1024  }
  0xac   :  { %4042 = vsyncadd [#allocation10], 4294966272 }
  0xad   :  { %4043 = dma.done.wait [#allocation13], 528  }
  0xae   :  { %4044 = vsyncadd [#allocation13], 4294966768 }
  0xaf   :  { %4045 = dma.done.wait [#allocation16], 1024  }
  0xb0   :  { %4046 = vsyncadd [#allocation16], 4294966272  ;;  %vm196_vm0 = vcmask 261120   ;;  %s5027_s21 = sld [smem:[#allocation25_spill]]  ;;  %v4328_v5 = vld [vmem:[#allocation4] sm:$0xff]  ;;  %v4330_v6 = vld [vmem:[#allocation4 + $0x8] sm:$0xff] }
  0xb1   :  { %197 = vst.msk [vmem:[#allocation2] sm:$0xff] %vm196_vm0, %v4328_v5  ;;  %198 = vst.msk [vmem:[#allocation2 + $0x8] sm:$0xff] %vm196_vm0, %v4330_v6  ;;  %v4336_v8 = vld [vmem:[#allocation4 + $0x10] sm:$0xff]  ;;  %v4338_v9 = vld [vmem:[#allocation4 + $0x18] sm:$0xff]  ;;  %vm4059_vm1 = vmmov 0   ;;  %vm1249_vm2 = vcmask 64512  }
  0xb2   :  { %v4340_v10 = vld [vmem:[#allocation4 + $0x20] sm:$0xff]  ;;  %199 = vst.msk [vmem:[#allocation2 + $0x10] sm:$0xff] %vm196_vm0, %v4336_v8  ;;  %200 = vst.msk [vmem:[#allocation2 + $0x18] sm:$0xff] %vm196_vm0, %v4338_v9  ;;  %v4346_v11 = vld [vmem:[#allocation4 + $0x28] sm:$0xff]  ;;  %vm1445_vm3 = vcmask 1043456   ;;  %vm2790_vm4 = vcmask 1041409  }
  0xb3   :  { %201 = vst.msk [vmem:[#allocation2 + $0x20] sm:$0xff] %vm196_vm0, %v4340_v10  ;;  %v4350_v12 = vld [vmem:[#allocation4 + $0x30] sm:$0xff]  ;;  %v4352_v13 = vld [vmem:[#allocation4 + $0x38] sm:$0xff]  ;;  %202 = vst.msk [vmem:[#allocation2 + $0x28] sm:$0xff] %vm196_vm0, %v4346_v11  ;;  %vm2792_vm5 = vcmask 1042434   ;;  %vm2794_vm6 = vcmask 1043459  }
  0xb4   :  { %203 = vst.msk [vmem:[#allocation2 + $0x30] sm:$0xff] %vm196_vm0, %v4350_v12  ;;  %204 = vst.msk [vmem:[#allocation2 + $0x38] sm:$0xff] %vm196_vm0, %v4352_v13  ;;  %v4360_v14 = vld [vmem:[#allocation6] sm:$0xff]  ;;  %v4362_v15 = vld [vmem:[#allocation6 + $0x8] sm:$0xff]  ;;  %vm2796_vm7 = vcmask 1044484   ;;  %vm2798_vm8 = vcmask 1045509  }
  0xb5   :  { %v4364_v16 = vld [vmem:[#allocation6 + $0x10] sm:$0xff]  ;;  %205 = vst.msk [vmem:[#allocation2 + $0x40] sm:$0xff] %vm196_vm0, %v4360_v14  ;;  %206 = vst.msk [vmem:[#allocation2 + $0x48] sm:$0xff] %vm196_vm0, %v4362_v15  ;;  %v4370_v17 = vld [vmem:[#allocation6 + $0x18] sm:$0xff]  ;;  %vm2800_vm9 = vcmask 1046534   ;;  %vm2802_vm10 = vcmask 1047559  }
  0xb6   :  { %v237_v0 = vld [vmem:[%s5027_s21] sm:$0xff]  ;;  %v238_v1 = vld [vmem:[%s5027_s21 + $0x8] sm:$0xff]  ;;  %v239_v2 = vld [vmem:[%s5027_s21 + $0x10] sm:$0xff]  ;;  %207 = vst.msk [vmem:[#allocation2 + $0x50] sm:$0xff] %vm196_vm0, %v4364_v16  ;;  %vm3141_vm11 = vcmask 31744  }
  0xb7   :  { %v241_v3 = vpack.c.bf16 %v238_v1, %v237_v0  ;;  %v240_v4 = vld [vmem:[%s5027_s21 + $0x18] sm:$0xff]  ;;  %v4374_v18 = vld [vmem:[#allocation6 + $0x20] sm:$0xff]  ;;  %v4376_v19 = vld [vmem:[#allocation6 + $0x28] sm:$0xff]  ;;  %208 = vst.msk [vmem:[#allocation2 + $0x58] sm:$0xff] %vm196_vm0, %v4370_v17 }
  0xb8   :  { %v242_v7 = vpack.c.bf16 %v240_v4, %v239_v2  ;;  %209 = vst.msk [vmem:[#allocation2 + $0x60] sm:$0xff] %vm196_vm0, %v4374_v18  ;;  %210 = vst.msk [vmem:[#allocation2 + $0x68] sm:$0xff] %vm196_vm0, %v4376_v19  ;;  %v4384_v20 = vld [vmem:[#allocation6 + $0x30] sm:$0xff]  ;;  %v4386_v21 = vld [vmem:[#allocation6 + $0x38] sm:$0xff] }
  0xb9   :  { %3381 = vmatprep.subr.bf16.mxu0 %v241_v3  ;;  %211 = vst.msk [vmem:[#allocation2 + $0x70] sm:$0xff] %vm196_vm0, %v4384_v20  ;;  %212 = vst.msk [vmem:[#allocation2 + $0x78] sm:$0xff] %vm196_vm0, %v4386_v21  ;;  %v213_v22 = vld [vmem:[#allocation2] sm:$0xff]  ;;  %v214_v23 = vld [vmem:[#allocation2 + $0x8] sm:$0xff] }
  0xba   :  { %3382 = vmatpush3.bf16.msra.mxu0 %v241_v3  ;;  %v4392_v24 = vpack.c.bf16 %v214_v23, %v213_v22  ;;  %v215_v25 = vld [vmem:[#allocation2 + $0x10] sm:$0xff]  ;;  %v216_v26 = vld [vmem:[#allocation2 + $0x18] sm:$0xff]  ;;  %v217_v27 = vld [vmem:[#allocation2 + $0x20] sm:$0xff] }
  0xbb   :  { %3383 = vmatprep.subr.bf16.mxu0 %v242_v7  ;;  %v4394_v28 = vpack.c.bf16 %v216_v26, %v215_v25  ;;  %v218_v29 = vld [vmem:[#allocation2 + $0x28] sm:$0xff]  ;;  %v219_v31 = vld [vmem:[#allocation2 + $0x30] sm:$0xff]  ;;  %v220_v32 = vld [vmem:[#allocation2 + $0x38] sm:$0xff] }
  0xbc   :  { %3385 = vmatprep.mubr.msk.bf16.mxu0 %vm196_vm0, %v4392_v24  ;;  %v4398_v30 = vpack.c.bf16 %v218_v29, %v217_v27  ;;  %v221_v33 = vld [vmem:[#allocation2 + $0x40] sm:$0xff]  ;;  %v222_v34 = vld [vmem:[#allocation2 + $0x48] sm:$0xff]  ;;  %v4404_v35 = vpack.c.bf16 %v220_v32, %v219_v31  ;;  %v397_v49 = vld [vmem:[#allocation8 + $0x10] sm:$0xff] }
  0xbd   :  { %v4406_v36 = vpack.c.bf16 %v222_v34, %v221_v33  ;;  %v223_v37 = vld [vmem:[#allocation2 + $0x50] sm:$0xff]  ;;  %v395_v46 = vld [vmem:[#allocation8] sm:$0xff]  ;;  %v396_v47 = vld [vmem:[#allocation8 + $0x8] sm:$0xff] }
  0xbe   :  { %3384 = vmatpush3.bf16.msra.mxu0 %v242_v7  ;;  %v224_v38 = vld [vmem:[#allocation2 + $0x58] sm:$0xff]  ;;  %v399_v48 = vpack.c.bf16 %v396_v47, %v395_v46  ;;  %v3164_v52 = vld [vmem:[%s5002_s3] ss:$0 sm:$0xff] }
  0xbf   :  { %v225_v39 = vld [vmem:[#allocation2 + $0x60] sm:$0xff]  ;;  %v226_v40 = vld [vmem:[#allocation2 + $0x68] sm:$0xff]  ;;  %v4412_v41 = vpack.c.bf16 %v224_v38, %v223_v37  ;;  %v398_v50 = vld [vmem:[#allocation8 + $0x18] sm:$0xff] }
  0xc0   :  { %v4414_v42 = vpack.c.bf16 %v226_v40, %v225_v39  ;;  %v227_v43 = vld [vmem:[#allocation2 + $0x70] sm:$0xff]  ;;  %v228_v44 = vld [vmem:[#allocation2 + $0x78] sm:$0xff]  ;;  %3401 = vmatprep.subr.bf16.mxu1 %v399_v48  ;;  %v400_v51 = vpack.c.bf16 %v398_v50, %v397_v49 }
  0xc1   :  { %3386 = vmatmul.mubr.msk.bf16.vlgmr.msra.gmra.mrb[0].mxu0 %vm196_vm0, %v4394_v28  ;;  %v4420_v45 = vpack.c.bf16 %v228_v44, %v227_v43  ;;  %3402 = vmatpush3.bf16.msra.mxu1 %v399_v48 }
  0xc2   :  { %3389 = vmatprep.mubr.msk.bf16.mxu0 %vm196_vm0, %v4398_v30  ;;  %3403 = vmatprep.subr.bf16.mxu1 %v400_v51 }
  0xc5   :  { %3404 = vmatpush3.bf16.msra.mxu1 %v400_v51 }
  0xc9   :  { %3390 = vmatmul.mubr.msk.bf16.gmra.mrb[4].mxu0 %vm196_vm0, %v4404_v35 }
  0xca   :  { %3393 = vmatprep.mubr.msk.bf16.mxu0 %vm196_vm0, %v4406_v36 }
  0xd1   :  { %3394 = vmatmul.mubr.msk.bf16.gmra.mrb[8].mxu0 %vm196_vm0, %v4412_v41 }
  0xd2   :  { %3397 = vmatprep.mubr.msk.bf16.mxu0 %vm196_vm0, %v4414_v42 }
  0xd9   :  { %3398 = vmatmul.mubr.msk.bf16.gmra.mrb[12].mxu0 %vm196_vm0, %v4420_v45 }
 0x194   :  { %v3387_v53 = vpop.f32.mrb[0].mxu0 }
 0x195   :  { %v317_v54 = vadd.f32 %v3387_v53, %v3164_v52  ;;  %v308_v55 = vpop.f32.mrb[1].mxu0 }
 0x196   :  { %v309_v56 = vadd.f32 %v3164_v52, %v308_v55  ;;  %v3388_v57 = vpop.f32.mrb[2].mxu0 }
 0x197   :  { %v320_v58 = vadd.f32 %v3388_v57, %v3164_v52  ;;  %v311_v59 = vpop.f32.mrb[3].mxu0  ;;  %v373_v61 = vmax.f32 %v317_v54, 0.0 }
 0x198   :  { %v312_v60 = vadd.f32 %v3164_v52, %v311_v59  ;;  %v371_v63 = vmax.f32 %v309_v56, 0.0 }
 0x199   :  { %v374_v62 = vmax.f32 %v320_v58, 0.0 }
 0x19a   :  { %v372_v0 = vmax.f32 %v312_v60, 0.0 }
 0x19b   :  { %v388_v1 = vpack.c.bf16 %v374_v62, %v373_v61 }
 0x19c   :  { %v3391_v2 = vpop.f32.mrb[4].mxu0  ;;  %v387_v3 = vpack.c.bf16 %v372_v0, %v371_v63 }
 0x19d   :  { %v333_v4 = vadd.f32 %v3391_v2, %v3164_v52  ;;  %v324_v7 = vpop.f32.mrb[5].mxu0 }
 0x19e   :  { %v325_v22 = vadd.f32 %v3164_v52, %v324_v7  ;;  %v3392_v23 = vpop.f32.mrb[6].mxu0  ;;  %3405 = vmatprep.mubr.msk.bf16.mxu1 %vm196_vm0, %v387_v3 }
 0x19f   :  { %v336_v25 = vadd.f32 %v3392_v23, %v3164_v52  ;;  %v327_v26 = vpop.f32.mrb[7].mxu0  ;;  %3406 = vmatmul.mubr.msk.bf16.vlgmr.msra.gmra.mrb[0].mxu1 %vm196_vm0, %v388_v1  ;;  %v377_v29 = vmax.f32 %v333_v4, 0.0 }
 0x1a0   :  { %v328_v27 = vadd.f32 %v3164_v52, %v327_v26  ;;  %v375_v32 = vmax.f32 %v325_v22, 0.0  ;;  %v4058_v22 = vmov 0.0  }
 0x1a1   :  { %v378_v31 = vmax.f32 %v336_v25, 0.0  ;;  %3421 = vmatprep.subr.bf16.mxu0 %v4058_v22  ;;  %3427 = vmatprep.subr.bf16.mxu1 %v4058_v22 }
 0x1a2   :  { %v376_v33 = vmax.f32 %v328_v27, 0.0  ;;  %3423 = vmatprep.mubr.msk.bf16.mxu0 %vm4059_vm1, %v4058_v22 }
 0x1a3   :  { %v390_v34 = vpack.c.bf16 %v378_v31, %v377_v29 }
 0x1a4   :  { %v389_v37 = vpack.c.bf16 %v376_v33, %v375_v32  ;;  %v3395_v38 = vpop.f32.mrb[8].mxu0 }
 0x1a5   :  { %v349_v39 = vadd.f32 %v3395_v38, %v3164_v52  ;;  %v340_v40 = vpop.f32.mrb[9].mxu0 }
 0x1a6   :  { %v341_v43 = vadd.f32 %v3164_v52, %v340_v40  ;;  %v3396_v44 = vpop.f32.mrb[10].mxu0  ;;  %3409 = vmatprep.mubr.msk.bf16.mxu1 %vm196_vm0, %v389_v37 }
 0x1a7   :  { %v352_v46 = vadd.f32 %v3396_v44, %v3164_v52  ;;  %v343_v47 = vpop.f32.mrb[11].mxu0  ;;  %3410 = vmatmul.mubr.msk.bf16.gmra.mrb[4].mxu1 %vm196_vm0, %v390_v34  ;;  %v381_v49 = vmax.f32 %v349_v39, 0.0  ;;  %v4448_v34 = vld [vmem:[%s5004_s5] ss:$0 sm:$0xff] }
 0x1a8   :  { %v344_v48 = vadd.f32 %v3164_v52, %v343_v47  ;;  %v379_v51 = vmax.f32 %v341_v43, 0.0 }
 0x1a9   :  { %v382_v50 = vmax.f32 %v352_v46, 0.0 }
 0x1aa   :  { %v380_v53 = vmax.f32 %v344_v48, 0.0 }
 0x1ab   :  { %v392_v54 = vpack.c.bf16 %v382_v50, %v381_v49 }
 0x1ac   :  { %v391_v55 = vpack.c.bf16 %v380_v53, %v379_v51  ;;  %v3399_v56 = vpop.f32.mrb[12].mxu0 }
 0x1ad   :  { %v365_v57 = vadd.f32 %v3399_v56, %v3164_v52  ;;  %v356_v58 = vpop.f32.mrb[13].mxu0 }
 0x1ae   :  { %3413 = vmatprep.mubr.msk.bf16.mxu1 %vm196_vm0, %v391_v55  ;;  %v357_v59 = vadd.f32 %v3164_v52, %v356_v58  ;;  %v3400_v60 = vpop.f32.mrb[14].mxu0 }
 0x1af   :  { %3414 = vmatmul.mubr.msk.bf16.gmra.mrb[8].mxu1 %vm196_vm0, %v392_v54  ;;  %v385_v61 = vmax.f32 %v365_v57, 0.0  ;;  %v368_v62 = vadd.f32 %v3400_v60, %v3164_v52  ;;  %v359_v63 = vpop.f32.mrb[15].mxu0 }
 0x1b0   :  { %v383_v0 = vmax.f32 %v357_v59, 0.0  ;;  %v360_v1 = vadd.f32 %v3164_v52, %v359_v63 }
 0x1b1   :  { %v386_v2 = vmax.f32 %v368_v62, 0.0 }
 0x1b2   :  { %v384_v3 = vmax.f32 %v360_v1, 0.0 }
 0x1b3   :  { %v394_v4 = vpack.c.bf16 %v386_v2, %v385_v61 }
 0x1b4   :  { %v393_v7 = vpack.c.bf16 %v384_v3, %v383_v0 }
 0x1b6   :  { %3417 = vmatprep.mubr.msk.bf16.mxu1 %vm196_vm0, %v393_v7 }
 0x1b7   :  { %3418 = vmatmul.mubr.msk.bf16.gmra.mrb[12].mxu1 %vm196_vm0, %v394_v4 }
 0x1b8   :  { %3429 = vmatprep.mubr.msk.bf16.mxu1 %vm4059_vm1, %v4058_v22 }
 0x272   :  { %v3407_v52 = vpop.f32.mrb[0].mxu1 }
 0x273   :  { %v466_v23 = vpop.f32.mrb[1].mxu1  ;;  %v475_v2 = vadd.f32 %v3407_v52, %v4448_v34 }
 0x274   :  { %v3408_v25 = vpop.f32.mrb[2].mxu1  ;;  %v467_v47 = vadd.f32 %v4448_v34, %v466_v23 }
 0x275   :  { %v469_v26 = vpop.f32.mrb[3].mxu1  ;;  %v478_v23 = vadd.f32 %v3408_v25, %v4448_v34 }
 0x276   :  { %v470_v51 = vadd.f32 %v4448_v34, %v469_v26  ;;  %v529_v58 = vmax.f32 %v467_v47, 0.0 }
 0x277   :  { %v532_v25 = vmax.f32 %v478_v23, 0.0 }
 0x278   :  { %v530_v63 = vmax.f32 %v470_v51, 0.0  ;;  %v545_v3 = vpack.c.bf16 %v529_v58, %v529_v58 }
 0x27a   :  { %v4441_v27 = vpop.f32.mrb[4].mxu1  ;;  %v546_v26 = vpack.c.bf16 %v530_v63, %v530_v63  ;;  %v562_v23 = vsel %vm196_vm0, %v545_v3, 0 }
 0x27b   :  { %v482_v29 = vpop.f32.mrb[5].mxu1 }
 0x27c   :  { %v4443_v31 = vpop.f32.mrb[6].mxu1 }
 0x27d   :  { %v485_v32 = vpop.f32.mrb[7].mxu1 }
 0x27e   :  { %v486_v51 = vadd.f32 %v4448_v34, %v485_v32 }
 0x280   :  { %v534_v32 = vmax.f32 %v486_v51, 0.0 }
 0x282   :  { %v3415_v33 = vpop.f32.mrb[8].mxu1  ;;  %v550_v63 = vpack.c.bf16 %v534_v32, %v534_v32 }
 0x283   :  { %v498_v37 = vpop.f32.mrb[9].mxu1  ;;  %v507_v43 = vadd.f32 %v3415_v33, %v4448_v34 }
 0x284   :  { %v499_v38 = vadd.f32 %v4448_v34, %v498_v37  ;;  %v3416_v39 = vpop.f32.mrb[10].mxu1 }
 0x285   :  { %v501_v40 = vpop.f32.mrb[11].mxu1  ;;  %v510_v49 = vadd.f32 %v3416_v39, %v4448_v34  ;;  %v539_v53 = vmax.f32 %v507_v43, 0.0 }
 0x286   :  { %v537_v44 = vmax.f32 %v499_v38, 0.0  ;;  %v502_v46 = vadd.f32 %v4448_v34, %v501_v40  ;;  %v531_v38 = vmax.f32 %v475_v2, 0.0 }
 0x287   :  { %v540_v59 = vmax.f32 %v510_v49, 0.0  ;;  %v4465_v0 = vpack.c.bf16 %v539_v53, %v539_v53 }
 0x288   :  { %v4454_v48 = vpack.c.bf16 %v537_v44, %v537_v44  ;;  %v538_v50 = vmax.f32 %v502_v46, 0.0  ;;  %v547_v44 = vpack.c.bf16 %v531_v38, %v531_v38  ;;  %v483_v46 = vadd.f32 %v4448_v34, %v482_v29 }
 0x289   :  { %v4470_v4 = vpack.c.bf16 %v540_v59, %v540_v59  ;;  %v657_v37 = vsel %vm196_vm0, %v4465_v0, 0  ;;  %v491_v59 = vadd.f32 %v4441_v27, %v4448_v34 }
 0x28a   :  { %v4458_v54 = vpack.c.bf16 %v538_v50, %v538_v50  ;;  %v565_v55 = vsel %vm196_vm0, %v4454_v48, 0  ;;  %v3419_v56 = vpop.f32.mrb[12].mxu1  ;;  %v548_v50 = vpack.c.bf16 %v532_v25, %v532_v25 }
 0x28b   :  { %3422 = vmatpush3.bf16.xpose.msra.mxu0 %v565_v55  ;;  %v514_v57 = vpop.f32.mrb[13].mxu1  ;;  %v703_v39 = vsel %vm196_vm0, %v4470_v4, 0  ;;  %v523_v40 = vadd.f32 %v3419_v56, %v4448_v34  ;;  %v533_v56 = vmax.f32 %v483_v46, 0.0  ;;  %v535_v2 = vmax.f32 %v491_v59, 0.0 }
 0x28c   :  { %v611_v60 = vsel %vm196_vm0, %v4458_v54, 0  ;;  %3433 = vmatprep.subr.bf16.mxu0 %v4058_v22  ;;  %v3420_v61 = vpop.f32.mrb[14].mxu1  ;;  %v515_v1 = vadd.f32 %v4448_v34, %v514_v57 }
 0x28d   :  { %3428 = vmatpush3.bf16.xpose.msra.mxu1 %v611_v60  ;;  %v517_v62 = vpop.f32.mrb[15].mxu1  ;;  %v526_v47 = vadd.f32 %v3420_v61, %v4448_v34  ;;  %v543_v53 = vmax.f32 %v523_v40, 0.0  ;;  %v549_v60 = vpack.c.bf16 %v533_v56, %v533_v56 }
 0x28e   :  { %3439 = vmatprep.subr.bf16.mxu1 %v4058_v22  ;;  %v518_v7 = vadd.f32 %v4448_v34, %v517_v62  ;;  %v541_v33 = vmax.f32 %v515_v1, 0.0  ;;  %v494_v62 = vadd.f32 %v4443_v31, %v4448_v34  ;;  %v551_v31 = vpack.c.bf16 %v535_v2, %v535_v2 }
 0x28f   :  { %v544_v57 = vmax.f32 %v526_v47, 0.0  ;;  %v559_v58 = vpack.c.bf16 %v543_v53, %v543_v53 }
 0x290   :  { %v542_v52 = vmax.f32 %v518_v7, 0.0  ;;  %v4486_v43 = vpack.c.bf16 %v541_v33, %v541_v33  ;;  %v536_v27 = vmax.f32 %v494_v62, 0.0  ;;  %v608_v33 = vsel %vm196_vm0, %v546_v26, 0 }
 0x291   :  { %v560_v61 = vpack.c.bf16 %v544_v57, %v544_v57  ;;  %v841_v1 = vsel %vm196_vm0, %v559_v58, 0 }
 0x292   :  { %3424 = vmatmul.mubr.msk.bf16.vlgmr.msra.gmra.mrb[16].mxu0 %vm196_vm0, %v545_v3  ;;  %v4491_v49 = vpack.c.bf16 %v542_v52, %v542_v52  ;;  %v749_v55 = vsel %vm196_vm0, %v4486_v43, 0  ;;  %v552_v34 = vpack.c.bf16 %v536_v27, %v536_v27  ;;  %v654_v3 = vsel %vm196_vm0, %v547_v44, 0 }
 0x293   :  { %3434 = vmatpush3.bf16.xpose.msra.mxu0 %v657_v37  ;;  %3435 = vmatprep.mubr.msk.bf16.mxu0 %vm4059_vm1, %v4058_v22  ;;  %v887_v7 = vsel %vm196_vm0, %v560_v61, 0 }
 0x294   :  { %3430 = vmatmul.mubr.msk.bf16.vlgmr.msra.gmra.mrb[16].mxu1 %vm196_vm0, %v546_v26  ;;  %3445 = vmatprep.subr.bf16.mxu0 %v4058_v22  ;;  %v795_v29 = vsel %vm196_vm0, %v4491_v49, 0  ;;  %v700_v26 = vsel %vm196_vm0, %v548_v50, 0 }
 0x295   :  { %3440 = vmatpush3.bf16.xpose.msra.mxu1 %v703_v39  ;;  %3441 = vmatprep.mubr.msk.bf16.mxu1 %vm4059_vm1, %v4058_v22 }
 0x296   :  { %3451 = vmatprep.subr.bf16.mxu1 %v4058_v22 }
 0x29a   :  { %3436 = vmatmul.mubr.msk.bf16.vlgmr.msra.gmra.mrb[20].mxu0 %vm196_vm0, %v547_v44 }
 0x29b   :  { %3446 = vmatpush3.bf16.xpose.msra.mxu0 %v749_v55  ;;  %3447 = vmatprep.mubr.msk.bf16.mxu0 %vm4059_vm1, %v4058_v22 }
 0x29c   :  { %3442 = vmatmul.mubr.msk.bf16.vlgmr.msra.gmra.mrb[20].mxu1 %vm196_vm0, %v548_v50  ;;  %3457 = vmatprep.subr.bf16.mxu0 %v4058_v22 }
 0x29d   :  { %3452 = vmatpush3.bf16.xpose.msra.mxu1 %v795_v29  ;;  %3453 = vmatprep.mubr.msk.bf16.mxu1 %vm4059_vm1, %v4058_v22 }
 0x29e   :  { %3463 = vmatprep.subr.bf16.mxu1 %v4058_v22 }
 0x2a2   :  { %3448 = vmatmul.mubr.msk.bf16.vlgmr.msra.gmra.mrb[24].mxu0 %vm196_vm0, %v549_v60 }
 0x2a3   :  { %3458 = vmatpush3.bf16.xpose.msra.mxu0 %v841_v1  ;;  %3459 = vmatprep.mubr.msk.bf16.mxu0 %vm4059_vm1, %v4058_v22 }
 0x2a4   :  { %3454 = vmatmul.mubr.msk.bf16.vlgmr.msra.gmra.mrb[24].mxu1 %vm196_vm0, %v550_v63  ;;  %3469 = vmatprep.subr.bf16.mxu0 %v4058_v22 }
 0x2a5   :  { %3464 = vmatpush3.bf16.xpose.msra.mxu1 %v887_v7  ;;  %3465 = vmatprep.mubr.msk.bf16.mxu1 %vm4059_vm1, %v4058_v22 }
 0x2a6   :  { %3475 = vmatprep.subr.bf16.mxu1 %v4058_v22 }
 0x2aa   :  { %3460 = vmatmul.mubr.msk.bf16.vlgmr.msra.gmra.mrb[28].mxu0 %vm196_vm0, %v551_v31 }
 0x2ab   :  { %3470 = vmatpush3.bf16.xpose.msra.mxu0 %v562_v23  ;;  %3471 = vmatprep.mubr.msk.bf16.mxu0 %vm4059_vm1, %v4058_v22 }
 0x2ac   :  { %3466 = vmatmul.mubr.msk.bf16.vlgmr.msra.gmra.mrb[28].mxu1 %vm196_vm0, %v552_v34  ;;  %3481 = vmatprep.subr.bf16.mxu0 %v4058_v22 }
 0x2ad   :  { %3476 = vmatpush3.bf16.xpose.msra.mxu1 %v608_v33  ;;  %3477 = vmatprep.mubr.msk.bf16.mxu1 %vm4059_vm1, %v4058_v22 }
 0x2ae   :  { %3487 = vmatprep.subr.bf16.mxu1 %v4058_v22 }
 0x2b2   :  { %3472 = vmatmul.mubr.msk.bf16.vlgmr.msra.gmra.mrb[32].mxu0 %vm196_vm0, %v4454_v48  ;;  %v746_v48 = vsel %vm196_vm0, %v549_v60, 0 }
 0x2b3   :  { %3482 = vmatpush3.bf16.xpose.msra.mxu0 %v654_v3  ;;  %3483 = vmatprep.mubr.msk.bf16.mxu0 %vm4059_vm1, %v4058_v22 }
 0x2b4   :  { %3478 = vmatmul.mubr.msk.bf16.vlgmr.msra.gmra.mrb[32].mxu1 %vm196_vm0, %v4458_v54  ;;  %3493 = vmatprep.subr.bf16.mxu0 %v4058_v22  ;;  %v792_v54 = vsel %vm196_vm0, %v550_v63, 0 }
 0x2b5   :  { %3488 = vmatpush3.bf16.xpose.msra.mxu1 %v700_v26  ;;  %3489 = vmatprep.mubr.msk.bf16.mxu1 %vm4059_vm1, %v4058_v22 }
 0x2b6   :  { %3499 = vmatprep.subr.bf16.mxu1 %v4058_v22 }
 0x2ba   :  { %3484 = vmatmul.mubr.msk.bf16.vlgmr.msra.gmra.mrb[36].mxu0 %vm196_vm0, %v4465_v0  ;;  %v838_v0 = vsel %vm196_vm0, %v551_v31, 0 }
 0x2bb   :  { %3494 = vmatpush3.bf16.xpose.msra.mxu0 %v746_v48  ;;  %3495 = vmatprep.mubr.msk.bf16.mxu0 %vm4059_vm1, %v4058_v22 }
 0x2bc   :  { %3490 = vmatmul.mubr.msk.bf16.vlgmr.msra.gmra.mrb[36].mxu1 %vm196_vm0, %v4470_v4  ;;  %3505 = vmatprep.subr.bf16.mxu0 %v4058_v22  ;;  %v884_v4 = vsel %vm196_vm0, %v552_v34, 0 }
 0x2bd   :  { %3500 = vmatpush3.bf16.xpose.msra.mxu1 %v792_v54  ;;  %3501 = vmatprep.mubr.msk.bf16.mxu1 %vm4059_vm1, %v4058_v22 }
 0x2be   :  { %3511 = vmatprep.subr.bf16.mxu1 %v4058_v22 }
 0x2c2   :  { %3496 = vmatmul.mubr.msk.bf16.vlgmr.msra.gmra.mrb[40].mxu0 %vm196_vm0, %v4486_v43 }
 0x2c3   :  { %3506 = vmatpush3.bf16.xpose.msra.mxu0 %v838_v0  ;;  %3507 = vmatprep.mubr.msk.bf16.mxu0 %vm4059_vm1, %v4058_v22 }
 0x2c4   :  { %3502 = vmatmul.mubr.msk.bf16.vlgmr.msra.gmra.mrb[40].mxu1 %vm196_vm0, %v4491_v49  ;;  %3517 = vmatprep.subr.bf16.mxu0 %v4058_v22 }
 0x2c5   :  { %3512 = vmatpush3.bf16.xpose.msra.mxu1 %v884_v4  ;;  %3513 = vmatprep.mubr.msk.bf16.mxu1 %vm4059_vm1, %v4058_v22 }
 0x2c6   :  { %3523 = vmatprep.subr.bf16.mxu1 %v4058_v22 }
 0x2ca   :  { %3508 = vmatmul.mubr.msk.bf16.vlgmr.msra.gmra.mrb[44].mxu0 %vm196_vm0, %v559_v58 }
 0x2cb   :  { %3519 = vmatprep.mubr.msk.bf16.mxu0 %vm4059_vm1, %v4058_v22 }
 0x2cc   :  { %3514 = vmatmul.mubr.msk.bf16.vlgmr.msra.gmra.mrb[44].mxu1 %vm196_vm0, %v560_v61 }
 0x2cd   :  { %3525 = vmatprep.mubr.msk.bf16.mxu1 %vm4059_vm1, %v4058_v22 }
 0x365   :  { %v4572_v37 = vpop.f32.mrb[16].mxu0 }
 0x366   :  { %v3425_v38 = vpop.f32.mrb[17].mxu0  ;;  %v1250_v52 = vsel %vm1249_vm2, %v4572_v37, -inf }
 0x367   :  { %v4576_v39 = vpop.f32.mrb[16].mxu1  ;;  %1251 = vmax.xlane.f32.xlu0 %v1250_v52  ;;  %v604_v25 = vpop.f32.mrb[18].mxu0 }
 0x368   :  { %v3426_v40 = vpop.f32.mrb[19].mxu0  ;;  %v3431_v43 = vpop.f32.mrb[17].mxu1  ;;  %v1253_v47 = vsel %vm1249_vm2, %v4576_v39, -inf }
 0x369   :  { %v650_v44 = vpop.f32.mrb[18].mxu1 }
 0x36a   :  { %v3432_v46 = vpop.f32.mrb[19].mxu1 }
 0x36b   :  { %1254 = vmax.xlane.f32.xlu0 %v1253_v47 }
 0x36d   :  { %v4580_v49 = vpop.f32.mrb[20].mxu0 }
 0x36e   :  { %v3437_v50 = vpop.f32.mrb[21].mxu0  ;;  %v1256_v51 = vsel %vm1249_vm2, %v4580_v49, -inf }
 0x36f   :  { %v4584_v53 = vpop.f32.mrb[20].mxu1  ;;  %1257 = vmax.xlane.f32.xlu1 %v1256_v51  ;;  %v696_v55 = vpop.f32.mrb[22].mxu0 }
 0x370   :  { %v3438_v56 = vpop.f32.mrb[23].mxu0  ;;  %v3443_v57 = vpop.f32.mrb[21].mxu1  ;;  %v1259_v58 = vsel %vm1249_vm2, %v4584_v53, -inf }
 0x371   :  { %v742_v29 = vpop.f32.mrb[22].mxu1 }
 0x372   :  { %v3444_v32 = vpop.f32.mrb[23].mxu1 }
 0x373   :  { %1260 = vmax.xlane.f32.xlu1 %v1259_v58 }
 0x375   :  { %v4588_v59 = vpop.f32.mrb[24].mxu0 }
 0x376   :  { %v3449_v60 = vpop.f32.mrb[25].mxu0  ;;  %v1262_v61 = vsel %vm1249_vm2, %v4588_v59, -inf }
 0x377   :  { %v4592_v62 = vpop.f32.mrb[24].mxu1  ;;  %1263 = vmax.xlane.f32.xlu0 %v1262_v61  ;;  %v788_v63 = vpop.f32.mrb[26].mxu0 }
 0x378   :  { %v3450_v1 = vpop.f32.mrb[27].mxu0  ;;  %v3455_v2 = vpop.f32.mrb[25].mxu1  ;;  %v1265_v7 = vsel %vm1249_vm2, %v4592_v62, -inf }
 0x379   :  { %v834_v27 = vpop.f32.mrb[26].mxu1  ;;  %1266 = vmax.xlane.f32.xlu1 %v1265_v7 }
 0x37a   :  { %v3456_v31 = vpop.f32.mrb[27].mxu1 }
 0x37d   :  { %v4596_v34 = vpop.f32.mrb[28].mxu0 }
 0x37e   :  { %v3461_v23 = vpop.f32.mrb[29].mxu0  ;;  %v1268_v33 = vsel %vm1249_vm2, %v4596_v34, -inf }
 0x37f   :  { %v4600_v3 = vpop.f32.mrb[28].mxu1  ;;  %1269 = vmax.xlane.f32.xlu0 %v1268_v33  ;;  %v880_v26 = vpop.f32.mrb[30].mxu0 }
 0x380   :  { %v3462_v48 = vpop.f32.mrb[31].mxu0  ;;  %v3467_v54 = vpop.f32.mrb[29].mxu1  ;;  %v1271_v0 = vsel %vm1249_vm2, %v4600_v3, -inf }
 0x381   :  { %v926_v4 = vpop.f32.mrb[30].mxu1  ;;  %1272 = vmax.xlane.f32.xlu1 %v1271_v0 }
 0x382   :  { %v3468_v38 = vpop.f32.mrb[31].mxu1 }
 0x385   :  { %v4604_v52 = vpop.f32.mrb[32].mxu0 }
 0x386   :  { %v3473_v25 = vpop.f32.mrb[33].mxu0  ;;  %v1338_v40 = vsel %vm1249_vm2, %v4604_v52, -inf }
 0x387   :  { %v4608_v43 = vpop.f32.mrb[32].mxu1  ;;  %1339 = vmax.xlane.f32.xlu0 %v1338_v40  ;;  %v966_v44 = vpop.f32.mrb[34].mxu0 }
 0x388   :  { %v3474_v46 = vpop.f32.mrb[35].mxu0  ;;  %v3479_v47 = vpop.f32.mrb[33].mxu1  ;;  %v1341_v50 = vsel %vm1249_vm2, %v4608_v43, -inf }
 0x389   :  { %v1006_v51 = vpop.f32.mrb[34].mxu1  ;;  %1342 = vmax.xlane.f32.xlu1 %v1341_v50 }
 0x38a   :  { %v3480_v55 = vpop.f32.mrb[35].mxu1 }
 0x38d   :  { %v4612_v56 = vpop.f32.mrb[36].mxu0 }
 0x38e   :  { %v3485_v57 = vpop.f32.mrb[37].mxu0  ;;  %v1344_v29 = vsel %vm1249_vm2, %v4612_v56, -inf }
 0x38f   :  { %v4616_v32 = vpop.f32.mrb[36].mxu1  ;;  %1345 = vmax.xlane.f32.xlu0 %v1344_v29  ;;  %v1046_v58 = vpop.f32.mrb[38].mxu0 }
 0x390   :  { %v3486_v60 = vpop.f32.mrb[39].mxu0  ;;  %v3491_v61 = vpop.f32.mrb[37].mxu1  ;;  %v1347_v63 = vsel %vm1249_vm2, %v4616_v32, -inf }
 0x391   :  { %v1086_v1 = vpop.f32.mrb[38].mxu1  ;;  %1348 = vmax.xlane.f32.xlu1 %v1347_v63 }
 0x392   :  { %v3492_v2 = vpop.f32.mrb[39].mxu1 }
 0x395   :  { %v4620_v7 = vpop.f32.mrb[40].mxu0 }
 0x396   :  { %v3497_v27 = vpop.f32.mrb[41].mxu0  ;;  %v1350_v31 = vsel %vm1249_vm2, %v4620_v7, -inf }
 0x397   :  { %v4624_v23 = vpop.f32.mrb[40].mxu1  ;;  %1351 = vmax.xlane.f32.xlu0 %v1350_v31  ;;  %v1126_v33 = vpop.f32.mrb[42].mxu0 }
 0x398   :  { %v3498_v26 = vpop.f32.mrb[43].mxu0  ;;  %v3503_v48 = vpop.f32.mrb[41].mxu1  ;;  %v1353_v54 = vsel %vm1249_vm2, %v4624_v23, -inf }
 0x399   :  { %v1166_v0 = vpop.f32.mrb[42].mxu1  ;;  %1354 = vmax.xlane.f32.xlu1 %v1353_v54 }
 0x39a   :  { %v3504_v4 = vpop.f32.mrb[43].mxu1 }
 0x39d   :  { %v4628_v38 = vpop.f32.mrb[44].mxu0 }
 0x39e   :  { %v3509_v25 = vpop.f32.mrb[45].mxu0  ;;  %v1356_v40 = vsel %vm1249_vm2, %v4628_v38, -inf }
 0x39f   :  { %v4632_v44 = vpop.f32.mrb[44].mxu1  ;;  %1357 = vmax.xlane.f32.xlu0 %v1356_v40  ;;  %v1206_v46 = vpop.f32.mrb[46].mxu0 }
 0x3a0   :  { %v3510_v47 = vpop.f32.mrb[47].mxu0  ;;  %v3515_v50 = vpop.f32.mrb[45].mxu1  ;;  %v1359_v51 = vsel %vm1249_vm2, %v4632_v44, -inf }
 0x3a1   :  { %v1246_v55 = vpop.f32.mrb[46].mxu1  ;;  %1360 = vmax.xlane.f32.xlu1 %v1359_v51 }
 0x3a2   :  { %v3516_v57 = vpop.f32.mrb[47].mxu1 }
 0x3f4   :  { %v1252_v29 = vpop.xlane.xlu0 %1251 }
 0x3f5   :  { %v1274_v58 = vsub.f32 %v4572_v37, %v1252_v29 }
 0x3f7   :  { %v1282_v60 = vmul.f32 1.442695, %v1274_v58 }
 0x3f8   :  { %v1255_v61 = vpop.xlane.xlu0 %1254 }
 0x3f9   :  { %3771 = vpow2.f32 %v1282_v60  ;;  %v1275_v63 = vsub.f32 %v4576_v39, %v1255_v61 }
 0x3fb   :  { %v1284_v1 = vmul.f32 1.442695, %v1275_v63 }
 0x3fc   :  { %v1258_v2 = vpop.xlane.xlu1 %1257 }
 0x3fd   :  { %3773 = vpow2.f32 %v1284_v1  ;;  %v1276_v27 = vsub.f32 %v4580_v49, %v1258_v2 }
 0x3ff   :  { %v1286_v31 = vmul.f32 1.442695, %v1276_v27 }
 0x400   :  { %v1261_v33 = vpop.xlane.xlu1 %1260 }
 0x401   :  { %3775 = vpow2.f32 %v1286_v31  ;;  %v1277_v26 = vsub.f32 %v4584_v53, %v1261_v33 }
 0x403   :  { %v4640_v48 = vpop.eup %3771  ;;  %v1288_v54 = vmul.f32 1.442695, %v1277_v26 }
 0x404   :  { %v1264_v0 = vpop.xlane.xlu0 %1263  ;;  %v1298_v37 = vsel %vm1249_vm2, %v4640_v48, 0.0 }
 0x405   :  { %3777 = vpow2.f32 %v1288_v54  ;;  %v1278_v39 = vsub.f32 %v4588_v59, %v1264_v0  ;;  %1299 = vadd.xlane.f32.xlu0 %v1298_v37 }
 0x406   :  { %v1267_v4 = vpop.xlane.xlu1 %1266 }
 0x407   :  { %v4645_v25 = vpop.eup %3773  ;;  %v1290_v49 = vmul.f32 1.442695, %v1278_v39  ;;  %v1279_v40 = vsub.f32 %v4592_v62, %v1267_v4 }
 0x408   :  { %v1301_v53 = vsel %vm1249_vm2, %v4645_v25, 0.0 }
 0x409   :  { %3779 = vpow2.f32 %v1290_v49  ;;  %v1292_v46 = vmul.f32 1.442695, %v1279_v40  ;;  %1302 = vadd.xlane.f32.xlu1 %v1301_v53 }
 0x40b   :  { %v4650_v47 = vpop.eup %3775  ;;  %3781 = vpow2.f32 %v1292_v46 }
 0x40c   :  { %v1270_v50 = vpop.xlane.xlu0 %1269  ;;  %v1304_v59 = vsel %vm1249_vm2, %v4650_v47, 0.0 }
 0x40d   :  { %v1280_v51 = vsub.f32 %v4596_v34, %v1270_v50  ;;  %1305 = vadd.xlane.f32.xlu0 %v1304_v59 }
 0x40e   :  { %v1273_v55 = vpop.xlane.xlu1 %1272 }
 0x40f   :  { %v4655_v57 = vpop.eup %3777  ;;  %v1294_v62 = vmul.f32 1.442695, %v1280_v51  ;;  %v1281_v29 = vsub.f32 %v4600_v3, %v1273_v55 }
 0x410   :  { %v1307_v58 = vsel %vm1249_vm2, %v4655_v57, 0.0 }
 0x411   :  { %3783 = vpow2.f32 %v1294_v62  ;;  %v1296_v60 = vmul.f32 1.442695, %v1281_v29  ;;  %1308 = vadd.xlane.f32.xlu1 %v1307_v58 }
 0x413   :  { %v4660_v61 = vpop.eup %3779  ;;  %3785 = vpow2.f32 %v1296_v60 }
 0x414   :  { %v1340_v63 = vpop.xlane.xlu0 %1339  ;;  %v1310_v34 = vsel %vm1249_vm2, %v4660_v61, 0.0 }
 0x415   :  { %v4664_v1 = vpop.eup %3781  ;;  %v1362_v2 = vsub.f32 %v4604_v52, %v1340_v63  ;;  %1311 = vadd.xlane.f32.xlu0 %v1310_v34  ;;  %v1434_v52 = vpack.c.bf16 %v4360_v14, %v4360_v14  ;;  %v1435_v14 = vpack.c.bf16 %v4362_v15, %v4362_v15 }
 0x416   :  { %v1343_v27 = vpop.xlane.xlu1 %1342  ;;  %v1313_v3 = vsel %vm1249_vm2, %v4664_v1, 0.0 }
 0x417   :  { %v1370_v31 = vmul.f32 1.442695, %v1362_v2  ;;  %v1363_v33 = vsub.f32 %v4608_v43, %v1343_v27  ;;  %1314 = vadd.xlane.f32.xlu1 %v1313_v3  ;;  %v1447_v40 = vsel %vm1445_vm3, %v1434_v52, 0  ;;  %v1493_v50 = vsel %vm1445_vm3, %v1435_v14, 0 }
 0x418   :  { %3518 = vmatpush3.bf16.msra.mxu0 %v1447_v40  ;;  %3524 = vmatpush3.bf16.msra.mxu1 %v1493_v50 }
 0x419   :  { %3787 = vpow2.f32 %v1370_v31  ;;  %v1372_v26 = vmul.f32 1.442695, %v1363_v33  ;;  %3529 = vmatprep.subr.bf16.mxu0 %v4058_v22  ;;  %3535 = vmatprep.subr.bf16.mxu1 %v4058_v22 }
 0x41b   :  { %v4670_v54 = vpop.eup %3783  ;;  %3789 = vpow2.f32 %v1372_v26 }
 0x41c   :  { %v1346_v0 = vpop.xlane.xlu0 %1345  ;;  %v1316_v37 = vsel %vm1249_vm2, %v4670_v54, 0.0 }
 0x41d   :  { %v4676_v39 = vpop.eup %3785  ;;  %v1364_v4 = vsub.f32 %v4612_v56, %v1346_v0  ;;  %1317 = vadd.xlane.f32.xlu0 %v1316_v37 }
 0x41e   :  { %v1349_v43 = vpop.xlane.xlu1 %1348  ;;  %v1319_v49 = vsel %vm1249_vm2, %v4676_v39, 0.0 }
 0x41f   :  { %v1374_v53 = vmul.f32 1.442695, %v1364_v4  ;;  %v1365_v46 = vsub.f32 %v4616_v32, %v1349_v43  ;;  %1320 = vadd.xlane.f32.xlu1 %v1319_v49 }
 0x421   :  { %3791 = vpow2.f32 %v1374_v53  ;;  %v1376_v56 = vmul.f32 1.442695, %v1365_v46 }
 0x423   :  { %v4687_v59 = vpop.eup %3787  ;;  %3793 = vpow2.f32 %v1376_v56  ;;  %v1436_v56 = vpack.c.bf16 %v4364_v16, %v4364_v16 }
 0x424   :  { %v1352_v51 = vpop.xlane.xlu0 %1351  ;;  %v1386_v55 = vsel %vm1249_vm2, %v4687_v59, 0.0 }
 0x425   :  { %v4692_v32 = vpop.eup %3789  ;;  %v1366_v15 = vsub.f32 %v4620_v7, %v1352_v51  ;;  %1387 = vadd.xlane.f32.xlu0 %v1386_v55 }
 0x426   :  { %v1355_v62 = vpop.xlane.xlu1 %1354  ;;  %v1389_v29 = vsel %vm1249_vm2, %v4692_v32, 0.0 }
 0x427   :  { %v1378_v58 = vmul.f32 1.442695, %v1366_v15  ;;  %v1367_v60 = vsub.f32 %v4624_v23, %v1355_v62  ;;  %1390 = vadd.xlane.f32.xlu1 %v1389_v29  ;;  %v1539_v62 = vsel %vm1445_vm3, %v1436_v56, 0  ;;  %v1437_v29 = vpack.c.bf16 %v4370_v17, %v4370_v17 }
 0x428   :  { %v1438_v17 = vpack.c.bf16 %v4374_v18, %v4374_v18 }
 0x429   :  { %3795 = vpow2.f32 %v1378_v58  ;;  %v1380_v63 = vmul.f32 1.442695, %v1367_v60 }
 0x42b   :  { %v4698_v34 = vpop.eup %3791  ;;  %3797 = vpow2.f32 %v1380_v63 }
 0x42c   :  { %v1358_v2 = vpop.xlane.xlu0 %1357  ;;  %v1392_v27 = vsel %vm1249_vm2, %v4698_v34, 0.0 }
 0x42d   :  { %v4702_v3 = vpop.eup %3793  ;;  %v1368_v7 = vsub.f32 %v4628_v38, %v1358_v2  ;;  %1393 = vadd.xlane.f32.xlu0 %v1392_v27  ;;  %v1585_v2 = vsel %vm1445_vm3, %v1437_v29, 0 }
 0x42e   :  { %v1361_v31 = vpop.xlane.xlu1 %1360  ;;  %v1395_v33 = vsel %vm1249_vm2, %v4702_v3, 0.0 }
 0x42f   :  { %v1382_v23 = vmul.f32 1.442695, %v1368_v7  ;;  %v1369_v26 = vsub.f32 %v4632_v44, %v1361_v31  ;;  %1396 = vadd.xlane.f32.xlu1 %v1395_v33  ;;  %v1631_v31 = vsel %vm1445_vm3, %v1438_v17, 0  ;;  %v1439_v33 = vpack.c.bf16 %v4376_v19, %v4376_v19 }
 0x430   :  { %v1440_v19 = vpack.c.bf16 %v4384_v20, %v4384_v20  ;;  %v1441_v20 = vpack.c.bf16 %v4386_v21, %v4386_v21 }
 0x431   :  { %3799 = vpow2.f32 %v1382_v23  ;;  %v1384_v0 = vmul.f32 1.442695, %v1369_v26 }
 0x433   :  { %v4708_v37 = vpop.eup %3795  ;;  %3801 = vpow2.f32 %v1384_v0 }
 0x434   :  { %v1398_v52 = vsel %vm1249_vm2, %v4708_v37, 0.0 }
 0x435   :  { %v4712_v4 = vpop.eup %3797  ;;  %1399 = vadd.xlane.f32.xlu0 %v1398_v52  ;;  %v1677_v52 = vsel %vm1445_vm3, %v1439_v33, 0 }
 0x436   :  { %v1401_v38 = vsel %vm1249_vm2, %v4712_v4, 0.0 }
 0x437   :  { %1402 = vadd.xlane.f32.xlu1 %v1401_v38 }
 0x43b   :  { %v4716_v43 = vpop.eup %3799 }
 0x43c   :  { %v1404_v44 = vsel %vm1249_vm2, %v4716_v43, 0.0 }
 0x43d   :  { %v4720_v49 = vpop.eup %3801  ;;  %1405 = vadd.xlane.f32.xlu0 %v1404_v44 }
 0x43e   :  { %v1407_v40 = vsel %vm1249_vm2, %v4720_v49, 0.0 }
 0x43f   :  { %1408 = vadd.xlane.f32.xlu1 %v1407_v40 }
 0x492   :  { %v1300_v53 = vpop.xlane.xlu0 %1299 }
 0x493   :  { %3803 = vrcp.f32 %v1300_v53 }
 0x496   :  { %v1303_v46 = vpop.xlane.xlu1 %1302 }
 0x497   :  { %3805 = vrcp.f32 %v1303_v46  ;;  %v1723_v46 = vsel %vm1445_vm3, %v1440_v19, 0  ;;  %v1825_v19 = vpack.c.bf16 %v4350_v12, %v4350_v12  ;;  %v1826_v12 = vpack.c.bf16 %v4352_v13, %v4352_v13 }
 0x49a   :  { %v1306_v14 = vpop.xlane.xlu0 %1305 }
 0x49b   :  { %3807 = vrcp.f32 %v1306_v14 }
 0x49d   :  { %v3804_v50 = vpop.eup %3803 }
 0x49e   :  { %v1330_v51 = vmul.f32 %v3804_v50, %v4640_v48  ;;  %v1309_v55 = vpop.xlane.xlu1 %1308  ;;  %v1819_v50 = vpack.c.bf16 %v4328_v5, %v4328_v5  ;;  %v1820_v5 = vpack.c.bf16 %v4330_v6, %v4330_v6 }
 0x49f   :  { %3809 = vrcp.f32 %v1309_v55 }
 0x4a0   :  { %v1426_v15 = vpack.c.bf16 %v1330_v51, %v1330_v51  ;;  %v1831_v29 = vsel %vm1445_vm3, %v1819_v50, 0  ;;  %v2242_v50 = vld [vmem:[#allocation11 + $0x8] sm:$0xff] }
 0x4a1   :  { %v3806_v58 = vpop.eup %3805 }
 0x4a2   :  { %v1331_v60 = vmul.f32 %v3806_v58, %v4645_v25  ;;  %3520 = vmatmul.mubr.msk.bf16.vlgmr.msra.gmra.mrb[48].mxu0 %vm1249_vm2, %v1426_v15  ;;  %v1312_v63 = vpop.xlane.xlu0 %1311 }
 0x4a3   :  { %3811 = vrcp.f32 %v1312_v63  ;;  %3530 = vmatpush3.bf16.msra.mxu0 %v1539_v62  ;;  %3531 = vmatprep.mubr.msk.bf16.mxu0 %vm4059_vm1, %v4058_v22  ;;  %v1821_v63 = vpack.c.bf16 %v4336_v8, %v4336_v8  ;;  %v1822_v8 = vpack.c.bf16 %v4338_v9, %v4338_v9 }
 0x4a4   :  { %v1315_v16 = vpop.xlane.xlu1 %1314  ;;  %v1427_v48 = vpack.c.bf16 %v1331_v60, %v1331_v60  ;;  %3541 = vmatprep.subr.bf16.mxu0 %v4058_v22 }
 0x4a5   :  { %v3808_v27 = vpop.eup %3807  ;;  %3813 = vrcp.f32 %v1315_v16 }
 0x4a6   :  { %v1332_v25 = vmul.f32 %v3808_v27, %v4650_v47  ;;  %3526 = vmatmul.mubr.msk.bf16.vlgmr.msra.gmra.mrb[48].mxu1 %vm1249_vm2, %v1427_v48  ;;  %v1923_v27 = vsel %vm1445_vm3, %v1821_v63, 0 }
 0x4a7   :  { %3536 = vmatpush3.bf16.msra.mxu1 %v1585_v2  ;;  %3537 = vmatprep.mubr.msk.bf16.mxu1 %vm4059_vm1, %v4058_v22 }
 0x4a8   :  { %v1428_v7 = vpack.c.bf16 %v1332_v25, %v1332_v25  ;;  %3547 = vmatprep.subr.bf16.mxu1 %v4058_v22 }
 0x4a9   :  { %v3810_v23 = vpop.eup %3809 }
 0x4aa   :  { %v1333_v18 = vmul.f32 %v3810_v23, %v4655_v57  ;;  %3532 = vmatmul.mubr.msk.bf16.vlgmr.msra.gmra.mrb[52].mxu0 %vm1249_vm2, %v1428_v7  ;;  %v1318_v47 = vpop.xlane.xlu0 %1317 }
 0x4ab   :  { %3815 = vrcp.f32 %v1318_v47  ;;  %3542 = vmatpush3.bf16.msra.mxu0 %v1631_v31  ;;  %3543 = vmatprep.mubr.msk.bf16.mxu0 %vm4059_vm1, %v4058_v22  ;;  %v1823_v31 = vpack.c.bf16 %v4340_v10, %v4340_v10  ;;  %v1824_v10 = vpack.c.bf16 %v4346_v11, %v4346_v11 }
 0x4ac   :  { %v1321_v26 = vpop.xlane.xlu1 %1320  ;;  %v1429_v0 = vpack.c.bf16 %v1333_v18, %v1333_v18  ;;  %3553 = vmatprep.subr.bf16.mxu0 %v4058_v22 }
 0x4ad   :  { %v3812_v38 = vpop.eup %3811  ;;  %3817 = vrcp.f32 %v1321_v26  ;;  %v2015_v26 = vsel %vm1445_vm3, %v1823_v31, 0 }
 0x4ae   :  { %v1334_v57 = vmul.f32 %v3812_v38, %v4660_v61  ;;  %3538 = vmatmul.mubr.msk.bf16.vlgmr.msra.gmra.mrb[52].mxu1 %vm1249_vm2, %v1429_v0 }
 0x4af   :  { %v3814_v44 = vpop.eup %3813  ;;  %3548 = vmatpush3.bf16.msra.mxu1 %v1677_v52  ;;  %3549 = vmatprep.mubr.msk.bf16.mxu1 %vm4059_vm1, %v4058_v22 }
 0x4b0   :  { %v1335_v40 = vmul.f32 %v3814_v44, %v4664_v1  ;;  %v1430_v53 = vpack.c.bf16 %v1334_v57, %v1334_v57  ;;  %3559 = vmatprep.subr.bf16.mxu1 %v4058_v22  ;;  %v1769_v1 = vsel %vm1445_vm3, %v1441_v20, 0 }
 0x4b2   :  { %3544 = vmatmul.mubr.msk.bf16.vlgmr.msra.gmra.mrb[56].mxu0 %vm1249_vm2, %v1430_v53  ;;  %v1388_v61 = vpop.xlane.xlu0 %1387  ;;  %v1431_v56 = vpack.c.bf16 %v1335_v40, %v1335_v40  ;;  %v2107_v53 = vsel %vm1445_vm3, %v1825_v19, 0 }
 0x4b3   :  { %3819 = vrcp.f32 %v1388_v61  ;;  %3554 = vmatpush3.bf16.msra.mxu0 %v1723_v46  ;;  %3555 = vmatprep.mubr.msk.bf16.mxu0 %vm4059_vm1, %v4058_v22  ;;  %v2153_v46 = vsel %vm1445_vm3, %v1826_v12, 0 }
 0x4b4   :  { %v1391_v14 = vpop.xlane.xlu1 %1390  ;;  %3565 = vmatprep.subr.bf16.mxu0 %v4058_v22 }
 0x4b5   :  { %v3816_v51 = vpop.eup %3815  ;;  %3821 = vrcp.f32 %v1391_v14 }
 0x4b6   :  { %v1336_v21 = vmul.f32 %v3816_v51, %v4670_v54  ;;  %3550 = vmatmul.mubr.msk.bf16.vlgmr.msra.gmra.mrb[56].mxu1 %vm1249_vm2, %v1431_v56 }
 0x4b7   :  { %v3818_v55 = vpop.eup %3817  ;;  %3560 = vmatpush3.bf16.msra.mxu1 %v1769_v1  ;;  %3561 = vmatprep.mubr.msk.bf16.mxu1 %vm4059_vm1, %v4058_v22  ;;  %v2241_v1 = vld [vmem:[#allocation11] sm:$0xff] }
 0x4b8   :  { %v1337_v15 = vmul.f32 %v3818_v55, %v4676_v39  ;;  %v1432_v62 = vpack.c.bf16 %v1336_v21, %v1336_v21  ;;  %3571 = vmatprep.subr.bf16.mxu1 %v4058_v22  ;;  %v1877_v39 = vsel %vm1445_vm3, %v1820_v5, 0  ;;  %v2245_v51 = vpack.c.bf16 %v2242_v50, %v2241_v1  ;;  %v2244_v21 = vld [vmem:[#allocation11 + $0x18] sm:$0xff] }
 0x4ba   :  { %3556 = vmatmul.mubr.msk.bf16.vlgmr.msra.gmra.mrb[60].mxu0 %vm1249_vm2, %v1432_v62  ;;  %v1394_v54 = vpop.xlane.xlu0 %1393  ;;  %v1433_v60 = vpack.c.bf16 %v1337_v15, %v1337_v15  ;;  %v2235_v15 = vld [vmem:[#allocation9] sm:$0xff]  ;;  %v2236_v62 = vld [vmem:[#allocation9 + $0x8] sm:$0xff] }
 0x4bb   :  { %3823 = vrcp.f32 %v1394_v54  ;;  %3566 = vmatpush3.bf16.msra.mxu0 %v1831_v29  ;;  %3567 = vmatprep.mubr.msk.bf16.mxu0 %vm4059_vm1, %v4058_v22  ;;  %v2239_v29 = vpack.c.bf16 %v2236_v62, %v2235_v15 }
 0x4bc   :  { %v1397_v58 = vpop.xlane.xlu1 %1396  ;;  %3577 = vmatprep.subr.bf16.mxu0 %v4058_v22 }
 0x4bd   :  { %v3820_v16 = vpop.eup %3819  ;;  %3825 = vrcp.f32 %v1397_v58 }
 0x4be   :  { %v1418_v6 = vmul.f32 %v3820_v16, %v4687_v59  ;;  %3562 = vmatmul.mubr.msk.bf16.vlgmr.msra.gmra.mrb[60].mxu1 %vm1249_vm2, %v1433_v60 }
 0x4bf   :  { %v3822_v48 = vpop.eup %3821  ;;  %3572 = vmatpush3.bf16.msra.mxu1 %v1877_v39  ;;  %3573 = vmatprep.mubr.msk.bf16.mxu1 %vm4059_vm1, %v4058_v22 }
 0x4c0   :  { %v1419_v2 = vmul.f32 %v3822_v48, %v4692_v32  ;;  %v1811_v17 = vpack.c.bf16 %v1418_v6, %v1418_v6  ;;  %3583 = vmatprep.subr.bf16.mxu1 %v4058_v22  ;;  %v1969_v32 = vsel %vm1445_vm3, %v1822_v8, 0 }
 0x4c2   :  { %3568 = vmatmul.mubr.msk.bf16.vlgmr.msra.gmra.mrb[64].mxu0 %vm1249_vm2, %v1811_v17  ;;  %v1400_v59 = vpop.xlane.xlu0 %1399  ;;  %v1812_v7 = vpack.c.bf16 %v1419_v2, %v1419_v2 }
 0x4c3   :  { %3827 = vrcp.f32 %v1400_v59  ;;  %3578 = vmatpush3.bf16.msra.mxu0 %v1923_v27  ;;  %3579 = vmatprep.mubr.msk.bf16.mxu0 %vm4059_vm1, %v4058_v22 }
 0x4c4   :  { %v1403_v25 = vpop.xlane.xlu1 %1402  ;;  %3589 = vmatprep.subr.bf16.mxu0 %v4058_v22 }
 0x4c5   :  { %v3824_v33 = vpop.eup %3823  ;;  %3829 = vrcp.f32 %v1403_v25 }
 0x4c6   :  { %v1420_v9 = vmul.f32 %v3824_v33, %v4698_v34  ;;  %3574 = vmatmul.mubr.msk.bf16.vlgmr.msra.gmra.mrb[64].mxu1 %vm1249_vm2, %v1812_v7 }
 0x4c7   :  { %v3826_v23 = vpop.eup %3825  ;;  %3584 = vmatpush3.bf16.msra.mxu1 %v1969_v32  ;;  %3585 = vmatprep.mubr.msk.bf16.mxu1 %vm4059_vm1, %v4058_v22 }
 0x4c8   :  { %v1421_v18 = vmul.f32 %v3826_v23, %v4702_v3  ;;  %v1813_v47 = vpack.c.bf16 %v1420_v9, %v1420_v9  ;;  %3595 = vmatprep.subr.bf16.mxu1 %v4058_v22  ;;  %v2061_v3 = vsel %vm1445_vm3, %v1824_v10, 0 }
 0x4ca   :  { %3580 = vmatmul.mubr.msk.bf16.vlgmr.msra.gmra.mrb[68].mxu0 %vm1249_vm2, %v1813_v47  ;;  %v1406_v34 = vpop.xlane.xlu0 %1405  ;;  %v1814_v52 = vpack.c.bf16 %v1421_v18, %v1421_v18  ;;  %v2237_v18 = vld [vmem:[#allocation9 + $0x10] sm:$0xff]  ;;  %v2238_v47 = vld [vmem:[#allocation9 + $0x18] sm:$0xff] }
 0x4cb   :  { %3831 = vrcp.f32 %v1406_v34  ;;  %3590 = vmatpush3.bf16.msra.mxu0 %v2015_v26  ;;  %3591 = vmatprep.mubr.msk.bf16.mxu0 %vm4059_vm1, %v4058_v22  ;;  %v2240_v19 = vpack.c.bf16 %v2238_v47, %v2237_v18 }
 0x4cc   :  { %v1409_v0 = vpop.xlane.xlu1 %1408  ;;  %3601 = vmatprep.subr.bf16.mxu0 %v4058_v22 }
 0x4cd   :  { %v3828_v38 = vpop.eup %3827  ;;  %3833 = vrcp.f32 %v1409_v0 }
 0x4ce   :  { %v1422_v11 = vmul.f32 %v3828_v38, %v4708_v37  ;;  %3586 = vmatmul.mubr.msk.bf16.vlgmr.msra.gmra.mrb[68].mxu1 %vm1249_vm2, %v1814_v52 }
 0x4cf   :  { %v3830_v57 = vpop.eup %3829  ;;  %3596 = vmatpush3.bf16.msra.mxu1 %v2061_v3  ;;  %3597 = vmatprep.mubr.msk.bf16.mxu1 %vm4059_vm1, %v4058_v22 }
 0x4d0   :  { %v1423_v44 = vmul.f32 %v3830_v57, %v4712_v4  ;;  %v1815_v40 = vpack.c.bf16 %v1422_v11, %v1422_v11  ;;  %3607 = vmatprep.subr.bf16.mxu1 %v4058_v22 }
 0x4d2   :  { %3592 = vmatmul.mubr.msk.bf16.vlgmr.msra.gmra.mrb[72].mxu0 %vm1249_vm2, %v1815_v40  ;;  %v1816_v37 = vpack.c.bf16 %v1423_v44, %v1423_v44 }
 0x4d3   :  { %3602 = vmatpush3.bf16.msra.mxu0 %v2107_v53  ;;  %3603 = vmatprep.mubr.msk.bf16.mxu0 %vm4059_vm1, %v4058_v22 }
 0x4d4   :  { %3613 = vmatprep.subr.bf16.mxu0 %v2245_v51 }
 0x4d5   :  { %v3832_v20 = vpop.eup %3831 }
 0x4d6   :  { %v1424_v4 = vmul.f32 %v3832_v20, %v4716_v43  ;;  %3598 = vmatmul.mubr.msk.bf16.vlgmr.msra.gmra.mrb[72].mxu1 %vm1249_vm2, %v1816_v37  ;;  %v2243_v43 = vld [vmem:[#allocation11 + $0x10] sm:$0xff] }
 0x4d7   :  { %v3834_v61 = vpop.eup %3833  ;;  %3608 = vmatpush3.bf16.msra.mxu1 %v2153_v46  ;;  %3609 = vmatprep.mubr.msk.bf16.mxu1 %vm4059_vm1, %v4058_v22  ;;  %v2246_v55 = vpack.c.bf16 %v2244_v21, %v2243_v43 }
 0x4d8   :  { %v1425_v13 = vmul.f32 %v3834_v61, %v4720_v49  ;;  %v1817_v14 = vpack.c.bf16 %v1424_v4, %v1424_v4 }
 0x4da   :  { %3604 = vmatmul.mubr.msk.bf16.vlgmr.msra.gmra.mrb[76].mxu0 %vm1249_vm2, %v1817_v14  ;;  %v1818_v56 = vpack.c.bf16 %v1425_v13, %v1425_v13 }
 0x4db   :  { %3614 = vmatpush3.bf16.msra.mxu0 %v2245_v51 }
 0x4dc   :  { %3615 = vmatprep.subr.bf16.mxu0 %v2246_v55 }
 0x4de   :  { %3610 = vmatmul.mubr.msk.bf16.vlgmr.msra.gmra.mrb[76].mxu1 %vm1249_vm2, %v1818_v56 }
 0x4df   :  { %3616 = vmatpush3.bf16.msra.mxu0 %v2246_v55 }
 0x4e0   :  { %3633 = vmatprep.subr.bf16.mxu0 %v2239_v29 }
 0x575   :  { %v1483_v49 = vpop.f32.mrb[48].mxu0 }
 0x576   :  { %2195 = vst.msk [vmem:[#allocation3] sm:$0xff] %vm196_vm0, %v1483_v49  ;;  %v3521_v5 = vpop.f32.mrb[49].mxu0 }
 0x577   :  { %v1486_v54 = vpop.f32.mrb[50].mxu0 }
 0x578   :  { %v3522_v58 = vpop.f32.mrb[51].mxu0 }
 0x579   :  { %v1529_v60 = vpop.f32.mrb[48].mxu1 }
 0x57a   :  { %2196 = vst.msk [vmem:[#allocation3 + $0x8] sm:$0xff] %vm196_vm0, %v1529_v60  ;;  %v3527_v39 = vpop.f32.mrb[49].mxu1 }
 0x57b   :  { %v1532_v63 = vpop.f32.mrb[50].mxu1 }
 0x57c   :  { %v3528_v16 = vpop.f32.mrb[51].mxu1 }
 0x57d   :  { %v1575_v6 = vpop.f32.mrb[52].mxu0  ;;  %v2211_v8 = vld [vmem:[#allocation3] sm:$0xff] }
 0x57e   :  { %2197 = vst.msk [vmem:[#allocation3 + $0x10] sm:$0xff] %vm196_vm0, %v1575_v6  ;;  %v3533_v48 = vpop.f32.mrb[53].mxu0 }
 0x57f   :  { %v1578_v2 = vpop.f32.mrb[54].mxu0 }
 0x580   :  { %v3534_v17 = vpop.f32.mrb[55].mxu0 }
 0x581   :  { %v1621_v27 = vpop.f32.mrb[52].mxu1  ;;  %v2212_v59 = vld [vmem:[#allocation3 + $0x8] sm:$0xff] }
 0x582   :  { %2198 = vst.msk [vmem:[#allocation3 + $0x18] sm:$0xff] %vm196_vm0, %v1621_v27  ;;  %v3539_v25 = vpop.f32.mrb[53].mxu1  ;;  %v2227_v7 = vpack.c.bf16 %v2212_v59, %v2211_v8 }
 0x583   :  { %v1624_v32 = vpop.f32.mrb[54].mxu1 }
 0x584   :  { %v3540_v31 = vpop.f32.mrb[55].mxu1  ;;  %3617 = vmatprep.mubr.msk.bf16.mxu0 %vm196_vm0, %v2227_v7 }
 0x585   :  { %v1667_v33 = vpop.f32.mrb[56].mxu0  ;;  %v2213_v34 = vld [vmem:[#allocation3 + $0x10] sm:$0xff] }
 0x586   :  { %2199 = vst.msk [vmem:[#allocation3 + $0x20] sm:$0xff] %vm196_vm0, %v1667_v33  ;;  %v3545_v9 = vpop.f32.mrb[57].mxu0 }
 0x587   :  { %v1670_v23 = vpop.f32.mrb[58].mxu0 }
 0x588   :  { %v3546_v26 = vpop.f32.mrb[59].mxu0 }
 0x589   :  { %v1713_v10 = vpop.f32.mrb[56].mxu1  ;;  %v2214_v0 = vld [vmem:[#allocation3 + $0x18] sm:$0xff] }
 0x58a   :  { %2200 = vst.msk [vmem:[#allocation3 + $0x28] sm:$0xff] %vm196_vm0, %v1713_v10  ;;  %v3551_v52 = vpop.f32.mrb[57].mxu1  ;;  %v2228_v3 = vpack.c.bf16 %v2214_v0, %v2213_v34 }
 0x58b   :  { %v1716_v38 = vpop.f32.mrb[58].mxu1 }
 0x58c   :  { %v3552_v11 = vpop.f32.mrb[59].mxu1  ;;  %3618 = vmatmul.mubr.msk.bf16.vlgmr.msra.gmra.mrb[80].mxu0 %vm196_vm0, %v2228_v3 }
 0x58d   :  { %v1759_v57 = vpop.f32.mrb[60].mxu0  ;;  %3634 = vmatpush3.bf16.msra.mxu0 %v2239_v29  ;;  %v2215_v37 = vld [vmem:[#allocation3 + $0x20] sm:$0xff] }
 0x58e   :  { %2201 = vst.msk [vmem:[#allocation3 + $0x30] sm:$0xff] %vm196_vm0, %v1759_v57  ;;  %v3557_v44 = vpop.f32.mrb[61].mxu0  ;;  %3635 = vmatprep.subr.bf16.mxu0 %v2240_v19 }
 0x58f   :  { %v1762_v40 = vpop.f32.mrb[62].mxu0 }
 0x590   :  { %v3558_v53 = vpop.f32.mrb[63].mxu0 }
 0x591   :  { %v1805_v12 = vpop.f32.mrb[60].mxu1  ;;  %v2216_v46 = vld [vmem:[#allocation3 + $0x28] sm:$0xff]  ;;  %3636 = vmatpush3.bf16.msra.mxu0 %v2240_v19 }
 0x592   :  { %2202 = vst.msk [vmem:[#allocation3 + $0x38] sm:$0xff] %vm196_vm0, %v1805_v12  ;;  %v3563_v20 = vpop.f32.mrb[61].mxu1  ;;  %v2229_v4 = vpack.c.bf16 %v2216_v46, %v2215_v37 }
 0x593   :  { %v1808_v61 = vpop.f32.mrb[62].mxu1 }
 0x594   :  { %v3564_v13 = vpop.f32.mrb[63].mxu1  ;;  %3621 = vmatprep.mubr.msk.bf16.mxu0 %vm196_vm0, %v2229_v4 }
 0x595   :  { %v1867_v14 = vpop.f32.mrb[64].mxu0  ;;  %v2217_v43 = vld [vmem:[#allocation3 + $0x30] sm:$0xff] }
 0x596   :  { %2203 = vst.msk [vmem:[#allocation3 + $0x40] sm:$0xff] %vm196_vm0, %v1867_v14  ;;  %v3569_v56 = vpop.f32.mrb[65].mxu0 }
 0x597   :  { %v1870_v1 = vpop.f32.mrb[66].mxu0 }
 0x598   :  { %v3570_v50 = vpop.f32.mrb[67].mxu0 }
 0x599   :  { %v1913_v51 = vpop.f32.mrb[64].mxu1  ;;  %v2218_v21 = vld [vmem:[#allocation3 + $0x38] sm:$0xff] }
 0x59a   :  { %2204 = vst.msk [vmem:[#allocation3 + $0x48] sm:$0xff] %vm196_vm0, %v1913_v51  ;;  %v3575_v55 = vpop.f32.mrb[65].mxu1  ;;  %v2230_v15 = vpack.c.bf16 %v2218_v21, %v2217_v43 }
 0x59b   :  { %v1916_v62 = vpop.f32.mrb[66].mxu1 }
 0x59c   :  { %v3576_v29 = vpop.f32.mrb[67].mxu1  ;;  %3622 = vmatmul.mubr.msk.bf16.gmra.mrb[84].mxu0 %vm196_vm0, %v2230_v15 }
 0x59d   :  { %v1959_v49 = vpop.f32.mrb[68].mxu0  ;;  %v2219_v39 = vld [vmem:[#allocation3 + $0x40] sm:$0xff] }
 0x59e   :  { %2205 = vst.msk [vmem:[#allocation3 + $0x50] sm:$0xff] %vm196_vm0, %v1959_v49  ;;  %v3581_v5 = vpop.f32.mrb[69].mxu0 }
 0x59f   :  { %v1962_v54 = vpop.f32.mrb[70].mxu0 }
 0x5a0   :  { %v3582_v58 = vpop.f32.mrb[71].mxu0 }
 0x5a1   :  { %v2005_v60 = vpop.f32.mrb[68].mxu1  ;;  %v2220_v63 = vld [vmem:[#allocation3 + $0x48] sm:$0xff] }
 0x5a2   :  { %2206 = vst.msk [vmem:[#allocation3 + $0x58] sm:$0xff] %vm196_vm0, %v2005_v60  ;;  %v3587_v16 = vpop.f32.mrb[69].mxu1  ;;  %v2231_v6 = vpack.c.bf16 %v2220_v63, %v2219_v39 }
 0x5a3   :  { %v2008_v48 = vpop.f32.mrb[70].mxu1 }
 0x5a4   :  { %v3588_v2 = vpop.f32.mrb[71].mxu1  ;;  %3625 = vmatprep.mubr.msk.bf16.mxu0 %vm196_vm0, %v2231_v6 }
 0x5a5   :  { %v2051_v17 = vpop.f32.mrb[72].mxu0  ;;  %v2221_v7 = vld [vmem:[#allocation3 + $0x50] sm:$0xff] }
 0x5a6   :  { %2207 = vst.msk [vmem:[#allocation3 + $0x60] sm:$0xff] %vm196_vm0, %v2051_v17  ;;  %v3593_v27 = vpop.f32.mrb[73].mxu0 }
 0x5a7   :  { %v2054_v8 = vpop.f32.mrb[74].mxu0 }
 0x5a8   :  { %v3594_v59 = vpop.f32.mrb[75].mxu0 }
 0x5a9   :  { %v2097_v25 = vpop.f32.mrb[72].mxu1  ;;  %v2222_v32 = vld [vmem:[#allocation3 + $0x58] sm:$0xff] }
 0x5aa   :  { %2208 = vst.msk [vmem:[#allocation3 + $0x68] sm:$0xff] %vm196_vm0, %v2097_v25  ;;  %v3599_v31 = vpop.f32.mrb[73].mxu1  ;;  %v2232_v33 = vpack.c.bf16 %v2222_v32, %v2221_v7 }
 0x5ab   :  { %v2100_v9 = vpop.f32.mrb[74].mxu1 }
 0x5ac   :  { %v3600_v23 = vpop.f32.mrb[75].mxu1  ;;  %3626 = vmatmul.mubr.msk.bf16.gmra.mrb[88].mxu0 %vm196_vm0, %v2232_v33 }
 0x5ad   :  { %v2143_v18 = vpop.f32.mrb[76].mxu0  ;;  %v2223_v0 = vld [vmem:[#allocation3 + $0x60] sm:$0xff] }
 0x5ae   :  { %2209 = vst.msk [vmem:[#allocation3 + $0x70] sm:$0xff] %vm196_vm0, %v2143_v18  ;;  %v3605_v47 = vpop.f32.mrb[77].mxu0 }
 0x5af   :  { %v2146_v26 = vpop.f32.mrb[78].mxu0 }
 0x5b0   :  { %v3606_v10 = vpop.f32.mrb[79].mxu0 }
 0x5b1   :  { %v2189_v34 = vpop.f32.mrb[76].mxu1  ;;  %v2224_v52 = vld [vmem:[#allocation3 + $0x68] sm:$0xff] }
 0x5b2   :  { %2210 = vst.msk [vmem:[#allocation3 + $0x78] sm:$0xff] %vm196_vm0, %v2189_v34  ;;  %v3611_v3 = vpop.f32.mrb[77].mxu1  ;;  %v2233_v19 = vpack.c.bf16 %v2224_v52, %v2223_v0 }
 0x5b3   :  { %v2192_v38 = vpop.f32.mrb[78].mxu1 }
 0x5b4   :  { %v3612_v11 = vpop.f32.mrb[79].mxu1  ;;  %3629 = vmatprep.mubr.msk.bf16.mxu0 %vm196_vm0, %v2233_v19 }
 0x5b5   :  { %v2225_v57 = vld [vmem:[#allocation3 + $0x70] sm:$0xff] }
 0x5b9   :  { %v2226_v44 = vld [vmem:[#allocation3 + $0x78] sm:$0xff] }
 0x5ba   :  { %v2234_v40 = vpack.c.bf16 %v2226_v44, %v2225_v57 }
 0x5bc   :  { %3630 = vmatmul.mubr.msk.bf16.gmra.mrb[92].mxu0 %vm196_vm0, %v2234_v40 }
 0x5bd   :  { %3637 = vmatprep.mubr.msk.bf16.mxu0 %vm196_vm0, %v4392_v24  ;;  %v2512_v24 = vld [vmem:[%s5008_s9] sm:$0xff] }
 0x5c4   :  { %3638 = vmatmul.mubr.msk.bf16.vlgmr.msra.gmra.mrb[80].mxu0 %vm196_vm0, %v4394_v28  ;;  %v2513_v28 = vld [vmem:[%s5008_s9 + $0x8] sm:$0xff] }
 0x5c5   :  { %3641 = vmatprep.mubr.msk.bf16.mxu0 %vm196_vm0, %v4398_v30  ;;  %v2516_v30 = vpack.c.bf16 %v2513_v28, %v2512_v24  ;;  %v2778_v24 = vld [vmem:[#allocation15] sm:$0xff]  ;;  %v2779_v28 = vld [vmem:[#allocation15 + $0x8] sm:$0xff] }
 0x5c7   :  { %3653 = vmatprep.subr.bf16.mxu1 %v2516_v30 }
 0x5c8   :  { %3654 = vmatpush3.bf16.msra.mxu1 %v2516_v30  ;;  %v3718_v30 = vpack.c.bf16 %v2779_v28, %v2778_v24 }
 0x5cc   :  { %3642 = vmatmul.mubr.msk.bf16.gmra.mrb[84].mxu0 %vm196_vm0, %v4404_v35  ;;  %v2514_v35 = vld [vmem:[%s5008_s9 + $0x10] sm:$0xff] }
 0x5cd   :  { %3645 = vmatprep.mubr.msk.bf16.mxu0 %vm196_vm0, %v4406_v36  ;;  %v2515_v36 = vld [vmem:[%s5008_s9 + $0x18] sm:$0xff] }
 0x5d4   :  { %3646 = vmatmul.mubr.msk.bf16.gmra.mrb[88].mxu0 %vm196_vm0, %v4412_v41  ;;  %v2517_v41 = vpack.c.bf16 %v2515_v36, %v2514_v35  ;;  %v4060_v35 = vmov 0.0|0.0   ;;  %v2780_v36 = vld [vmem:[#allocation15 + $0x10] sm:$0xff] }
 0x5d5   :  { %3649 = vmatprep.mubr.msk.bf16.mxu0 %vm196_vm0, %v4414_v42  ;;  %v3230_v42 = vld [vmem:[#allocation12] ss:$0 sm:$0xff] }
 0x5d6   :  { %3655 = vmatprep.subr.bf16.mxu1 %v2517_v41 }
 0x5d7   :  { %3656 = vmatpush3.bf16.msra.mxu1 %v2517_v41  ;;  %v2781_v41 = vld [vmem:[#allocation15 + $0x18] sm:$0xff] }
 0x5d8   :  { %3717 = vmatprep.subr.bf16.mxu1 %v4060_v35 }
 0x5dc   :  { %3650 = vmatmul.mubr.msk.bf16.gmra.mrb[92].mxu0 %vm196_vm0, %v4420_v45 }
 0x697   :  { %v3639_v45 = vpop.f32.mrb[80].mxu0 }
 0x698   :  { %v2474_v53 = vadd.f32 %v3639_v45, %v3230_v42  ;;  %v2402_v12 = vpop.f32.mrb[81].mxu0  ;;  %v4906_v45 = vld [vmem:[%s5009_s10] ss:$0 sm:$0xff] }
 0x699   :  { %v2472_v37 = vadd.f32 %v3230_v42, %v2402_v12  ;;  %v3640_v46 = vpop.f32.mrb[82].mxu0 }
 0x69a   :  { %v2475_v20 = vadd.f32 %v3640_v46, %v3230_v42  ;;  %v2405_v4 = vpop.f32.mrb[83].mxu0  ;;  %v2490_v13 = vmax.f32 %v2474_v53, 0.0 }
 0x69b   :  { %v2473_v61 = vadd.f32 %v3230_v42, %v2405_v4  ;;  %v2488_v56 = vmax.f32 %v2472_v37, 0.0 }
 0x69c   :  { %v2491_v14 = vmax.f32 %v2475_v20, 0.0 }
 0x69d   :  { %v2489_v1 = vmax.f32 %v2473_v61, 0.0 }
 0x69e   :  { %v2505_v50 = vpack.c.bf16 %v2491_v14, %v2490_v13 }
 0x69f   :  { %v2504_v51 = vpack.c.bf16 %v2489_v1, %v2488_v56  ;;  %v3643_v43 = vpop.f32.mrb[84].mxu0 }
 0x6a0   :  { %v2478_v21 = vadd.f32 %v3643_v43, %v3230_v42  ;;  %v2418_v55 = vpop.f32.mrb[85].mxu0 }
 0x6a1   :  { %v2476_v15 = vadd.f32 %v3230_v42, %v2418_v55  ;;  %v3644_v62 = vpop.f32.mrb[86].mxu0  ;;  %3657 = vmatprep.mubr.msk.bf16.mxu1 %vm196_vm0, %v2504_v51 }
 0x6a2   :  { %v2479_v29 = vadd.f32 %v3644_v62, %v3230_v42  ;;  %v2421_v49 = vpop.f32.mrb[87].mxu0  ;;  %3658 = vmatmul.mubr.msk.bf16.vlgmr.msra.gmra.mrb[80].mxu1 %vm196_vm0, %v2505_v50  ;;  %v2494_v54 = vmax.f32 %v2478_v21, 0.0 }
 0x6a3   :  { %v2477_v5 = vadd.f32 %v3230_v42, %v2421_v49  ;;  %v2492_v60 = vmax.f32 %v2476_v15, 0.0  ;;  %3719 = vmatpush3.bf16.msra.mxu1 %v3718_v30 }
 0x6a4   :  { %v2495_v58 = vmax.f32 %v2479_v29, 0.0  ;;  %3720 = vmatprep.subr.bf16.mxu1 %v4060_v35 }
 0x6a5   :  { %v2493_v39 = vmax.f32 %v2477_v5, 0.0 }
 0x6a6   :  { %v2507_v63 = vpack.c.bf16 %v2495_v58, %v2494_v54 }
 0x6a7   :  { %v2506_v16 = vpack.c.bf16 %v2493_v39, %v2492_v60  ;;  %v3647_v6 = vpop.f32.mrb[88].mxu0 }
 0x6a8   :  { %v2482_v48 = vadd.f32 %v3647_v6, %v3230_v42  ;;  %v2434_v2 = vpop.f32.mrb[89].mxu0 }
 0x6a9   :  { %v2480_v17 = vadd.f32 %v3230_v42, %v2434_v2  ;;  %v3648_v27 = vpop.f32.mrb[90].mxu0  ;;  %3661 = vmatprep.mubr.msk.bf16.mxu1 %vm196_vm0, %v2506_v16 }
 0x6aa   :  { %v2483_v8 = vadd.f32 %v3648_v27, %v3230_v42  ;;  %v2437_v59 = vpop.f32.mrb[91].mxu0  ;;  %3662 = vmatmul.mubr.msk.bf16.gmra.mrb[84].mxu1 %vm196_vm0, %v2507_v63  ;;  %v2498_v7 = vmax.f32 %v2482_v48, 0.0 }
 0x6ab   :  { %v2481_v25 = vadd.f32 %v3230_v42, %v2437_v59  ;;  %v2496_v31 = vmax.f32 %v2480_v17, 0.0 }
 0x6ac   :  { %v2499_v32 = vmax.f32 %v2483_v8, 0.0 }
 0x6ad   :  { %v2497_v33 = vmax.f32 %v2481_v25, 0.0 }
 0x6ae   :  { %v2509_v9 = vpack.c.bf16 %v2499_v32, %v2498_v7 }
 0x6af   :  { %v2508_v23 = vpack.c.bf16 %v2497_v33, %v2496_v31  ;;  %v3651_v18 = vpop.f32.mrb[92].mxu0 }
 0x6b0   :  { %v2486_v47 = vadd.f32 %v3651_v18, %v3230_v42  ;;  %v2450_v26 = vpop.f32.mrb[93].mxu0 }
 0x6b1   :  { %v2484_v10 = vadd.f32 %v3230_v42, %v2450_v26  ;;  %v3652_v34 = vpop.f32.mrb[94].mxu0  ;;  %3665 = vmatprep.mubr.msk.bf16.mxu1 %vm196_vm0, %v2508_v23 }
 0x6b2   :  { %v2487_v0 = vadd.f32 %v3652_v34, %v3230_v42  ;;  %v2453_v52 = vpop.f32.mrb[95].mxu0  ;;  %3666 = vmatmul.mubr.msk.bf16.gmra.mrb[88].mxu1 %vm196_vm0, %v2509_v9  ;;  %v2502_v19 = vmax.f32 %v2486_v47, 0.0 }
 0x6b3   :  { %v2485_v3 = vadd.f32 %v3230_v42, %v2453_v52  ;;  %v2500_v11 = vmax.f32 %v2484_v10, 0.0  ;;  %v3721_v42 = vpack.c.bf16 %v2781_v41, %v2780_v36 }
 0x6b4   :  { %v2503_v38 = vmax.f32 %v2487_v0, 0.0 }
 0x6b5   :  { %v2501_v57 = vmax.f32 %v2485_v3, 0.0  ;;  %3722 = vmatpush3.bf16.msra.mxu1 %v3721_v42 }
 0x6b6   :  { %v2511_v44 = vpack.c.bf16 %v2503_v38, %v2502_v19  ;;  %3723 = vmatprep.subr.bf16.mxu1 %v4060_v35 }
 0x6b7   :  { %v2510_v40 = vpack.c.bf16 %v2501_v57, %v2500_v11 }
 0x6b9   :  { %3669 = vmatprep.mubr.msk.bf16.mxu1 %vm196_vm0, %v2510_v40 }
 0x6ba   :  { %3670 = vmatmul.mubr.msk.bf16.gmra.mrb[92].mxu1 %vm196_vm0, %v2511_v44 }
 0x6bb   :  { %3681 = vmatprep.mubr.msk.f32.mxu1 %vm4059_vm1, %v4058_v22 }
 0x775   :  { %v3659_v53 = vpop.f32.mrb[80].mxu1 }
 0x776   :  { %v2592_v12 = vadd.f32 %v3659_v53, %v4906_v45  ;;  %v2583_v37 = vpop.f32.mrb[81].mxu1 }
 0x777   :  { %v2584_v46 = vadd.f32 %v4906_v45, %v2583_v37  ;;  %v3660_v20 = vpop.f32.mrb[82].mxu1 }
 0x778   :  { %v2648_v4 = vmax.f32 %v2592_v12, 0.0  ;;  %v2595_v61 = vadd.f32 %v3660_v20, %v4906_v45  ;;  %v2586_v13 = vpop.f32.mrb[83].mxu1 }
 0x779   :  { %v2646_v14 = vmax.f32 %v2584_v46, 0.0  ;;  %v2587_v56 = vadd.f32 %v4906_v45, %v2586_v13 }
 0x77a   :  { %v2676_v1 = vsel %vm196_vm0, %v2648_v4, 0.0  ;;  %v2649_v50 = vmax.f32 %v2595_v61, 0.0 }
 0x77b   :  { %v2677_v51 = vrot.slane %v2676_v1, 4  ;;  %v2662_v43 = vsel %vm196_vm0, %v2646_v14, 0.0  ;;  %v2647_v21 = vmax.f32 %v2587_v56, 0.0 }
 0x77c   :  { %v2663_v55 = vrot.slane %v2662_v43, 4  ;;  %v2683_v15 = vsel %vm196_vm0, %v2649_v50, 0.0 }
 0x77d   :  { %v2678_v62 = vadd.f32 %v2677_v51, %v2676_v1  ;;  %v2684_v29 = vrot.slane %v2683_v15, 4  ;;  %v2669_v49 = vsel %vm196_vm0, %v2647_v21, 0.0  ;;  %v3663_v5 = vpop.f32.mrb[84].mxu1 }
 0x77e   :  { %v2664_v54 = vadd.f32 %v2663_v55, %v2662_v43  ;;  %v2670_v58 = vrot.slane %v2669_v49, 4  ;;  %v2608_v60 = vadd.f32 %v3663_v5, %v4906_v45  ;;  %v2599_v39 = vpop.f32.mrb[85].mxu1 }
 0x77f   :  { %v2679_v63 = vrot.slane %v2678_v62, 2  ;;  %v2685_v16 = vadd.f32 %v2684_v29, %v2683_v15  ;;  %v2600_v6 = vadd.f32 %v4906_v45, %v2599_v39  ;;  %v3664_v48 = vpop.f32.mrb[86].mxu1 }
 0x780   :  { %v2665_v2 = vrot.slane %v2664_v54, 2  ;;  %v2671_v17 = vadd.f32 %v2670_v58, %v2669_v49  ;;  %v2652_v27 = vmax.f32 %v2608_v60, 0.0  ;;  %v2611_v8 = vadd.f32 %v3664_v48, %v4906_v45  ;;  %v2602_v59 = vpop.f32.mrb[87].mxu1 }
 0x781   :  { %v2680_v25 = vadd.f32 %v2679_v63, %v2678_v62  ;;  %v2686_v7 = vrot.slane %v2685_v16, 2  ;;  %v2650_v32 = vmax.f32 %v2600_v6, 0.0  ;;  %v2603_v31 = vadd.f32 %v4906_v45, %v2602_v59 }
 0x782   :  { %v2666_v33 = vadd.f32 %v2665_v2, %v2664_v54  ;;  %v2672_v9 = vrot.slane %v2671_v17, 2  ;;  %v2704_v23 = vsel %vm196_vm0, %v2652_v27, 0.0  ;;  %v2653_v18 = vmax.f32 %v2611_v8, 0.0 }
 0x783   :  { %v2681_v47 = vrot.slane %v2680_v25, 1  ;;  %v2705_v26 = vrot.slane %v2704_v23, 4  ;;  %v2690_v10 = vsel %vm196_vm0, %v2650_v32, 0.0  ;;  %v2687_v19 = vadd.f32 %v2686_v7, %v2685_v16 }
 0x784   :  { %v2667_v34 = vrot.slane %v2666_v33, 1  ;;  %v2673_v0 = vadd.f32 %v2672_v9, %v2671_v17  ;;  %v2691_v52 = vrot.slane %v2690_v10, 4  ;;  %v2711_v3 = vsel %vm196_vm0, %v2653_v18, 0.0 }
 0x785   :  { %v2706_v38 = vadd.f32 %v2705_v26, %v2704_v23  ;;  %v2712_v11 = vrot.slane %v2711_v3, 4  ;;  %v3667_v57 = vpop.f32.mrb[88].mxu1  ;;  %v2682_v44 = vadd.f32 %v2681_v47, %v2680_v25  ;;  %v2651_v28 = vmax.f32 %v2603_v31, 0.0 }
 0x786   :  { %v2674_v40 = vrot.slane %v2673_v0, 1  ;;  %v2692_v24 = vadd.f32 %v2691_v52, %v2690_v10  ;;  %v2615_v30 = vpop.f32.mrb[89].mxu1  ;;  %v2668_v36 = vadd.f32 %v2667_v34, %v2666_v33  ;;  %v2624_v53 = vadd.f32 %v3667_v57, %v4906_v45 }
 0x787   :  { %v2707_v41 = vrot.slane %v2706_v38, 2  ;;  %v2713_v42 = vadd.f32 %v2712_v11, %v2711_v3  ;;  %v3668_v12 = vpop.f32.mrb[90].mxu1  ;;  %v2697_v20 = vsel %vm196_vm0, %v2651_v28, 0.0  ;;  %v2616_v4 = vadd.f32 %v4906_v45, %v2615_v30 }
 0x788   :  { %v2675_v37 = vadd.f32 %v2674_v40, %v2673_v0  ;;  %v2693_v46 = vrot.slane %v2692_v24, 2  ;;  %v2618_v61 = vpop.f32.mrb[91].mxu1  ;;  %v2688_v13 = vrot.slane %v2687_v19, 1  ;;  %v2698_v56 = vrot.slane %v2697_v20, 4 }
 0x789   :  { %v2714_v14 = vrot.slane %v2713_v42, 2  ;;  %v2656_v1 = vmax.f32 %v2624_v53, 0.0  ;;  %v2708_v51 = vadd.f32 %v2707_v41, %v2706_v38  ;;  %v2654_v43 = vmax.f32 %v2616_v4, 0.0 }
 0x78a   :  { %v2884_v50 = vsel %vm2790_vm4, %v2675_v37, %v2668_v36  ;;  %v2627_v21 = vadd.f32 %v3668_v12, %v4906_v45  ;;  %v2694_v15 = vadd.f32 %v2693_v46, %v2692_v24  ;;  %v2699_v62 = vadd.f32 %v2698_v56, %v2697_v20 }
 0x78b   :  { %v4929_v55 = vsel %vm2792_vm5, %v2682_v44, %v2884_v50  ;;  %v2732_v29 = vsel %vm196_vm0, %v2656_v1, 0.0  ;;  %v2718_v49 = vsel %vm196_vm0, %v2654_v43, 0.0  ;;  %v2689_v54 = vadd.f32 %v2688_v13, %v2687_v19 }
 0x78c   :  { %v2657_v5 = vmax.f32 %v2627_v21, 0.0  ;;  %v2715_v58 = vadd.f32 %v2714_v14, %v2713_v42  ;;  %v2700_v60 = vrot.slane %v2699_v62, 2  ;;  %v2733_v39 = vrot.slane %v2732_v29, 4 }
 0x78d   :  { %v3671_v63 = vpop.f32.mrb[92].mxu1  ;;  %v2709_v16 = vrot.slane %v2708_v51, 1  ;;  %v2719_v6 = vrot.slane %v2718_v49, 4  ;;  %v2619_v2 = vadd.f32 %v4906_v45, %v2618_v61  ;;  %v2695_v27 = vrot.slane %v2694_v15, 1 }
 0x78e   :  { %v2739_v48 = vsel %vm196_vm0, %v2657_v5, 0.0  ;;  %v2631_v17 = vpop.f32.mrb[93].mxu1  ;;  %v2701_v8 = vadd.f32 %v2700_v60, %v2699_v62  ;;  %v2734_v59 = vadd.f32 %v2733_v39, %v2732_v29  ;;  %v2640_v33 = vadd.f32 %v3671_v63, %v4906_v45 }
 0x78f   :  { %v2740_v25 = vrot.slane %v2739_v48, 4  ;;  %v3672_v7 = vpop.f32.mrb[94].mxu1  ;;  %v2720_v32 = vadd.f32 %v2719_v6, %v2718_v49  ;;  %v2655_v31 = vmax.f32 %v2619_v2, 0.0  ;;  %v2632_v9 = vadd.f32 %v4906_v45, %v2631_v17 }
 0x790   :  { %v2634_v23 = vpop.f32.mrb[95].mxu1  ;;  %v2716_v18 = vrot.slane %v2715_v58, 1  ;;  %v2735_v47 = vrot.slane %v2734_v59, 2  ;;  %v2643_v10 = vadd.f32 %v3672_v7, %v4906_v45  ;;  %v2660_v52 = vmax.f32 %v2640_v33, 0.0 }
 0x791   :  { %v2741_v26 = vadd.f32 %v2740_v25, %v2739_v48  ;;  %v2721_v34 = vrot.slane %v2720_v32, 2  ;;  %v2725_v0 = vsel %vm196_vm0, %v2655_v31, 0.0  ;;  %v2658_v3 = vmax.f32 %v2632_v9, 0.0 }
 0x792   :  { %v2710_v19 = vadd.f32 %v2709_v16, %v2708_v51  ;;  %v2702_v38 = vrot.slane %v2701_v8, 1  ;;  %v2726_v57 = vrot.slane %v2725_v0, 4  ;;  %v2736_v44 = vadd.f32 %v2735_v47, %v2734_v59 }
 0x793   :  { %v2742_v11 = vrot.slane %v2741_v26, 2  ;;  %v2760_v40 = vsel %vm196_vm0, %v2660_v52, 0.0  ;;  %v2746_v24 = vsel %vm196_vm0, %v2658_v3, 0.0  ;;  %v2661_v28 = vmax.f32 %v2643_v10, 0.0 }
 0x794   :  { %v2696_v30 = vadd.f32 %v2695_v27, %v2694_v15  ;;  %v2722_v36 = vadd.f32 %v2721_v34, %v2720_v32  ;;  %v2727_v41 = vadd.f32 %v2726_v57, %v2725_v0  ;;  %v2761_v42 = vrot.slane %v2760_v40, 4  ;;  %v2774_v34 = vld [vmem:[#allocation14] sm:$0xff]  ;;  %v2775_v0 = vld [vmem:[#allocation14 + $0x8] sm:$0xff] }
 0x795   :  { %v2717_v53 = vadd.f32 %v2716_v18, %v2715_v58  ;;  %v2747_v12 = vrot.slane %v2746_v24, 4  ;;  %v2767_v37 = vsel %vm196_vm0, %v2661_v28, 0.0  ;;  %v2635_v46 = vadd.f32 %v4906_v45, %v2634_v23 }
 0x796   :  { %v2703_v20 = vadd.f32 %v2702_v38, %v2701_v8  ;;  %v2743_v4 = vadd.f32 %v2742_v11, %v2741_v26  ;;  %v2728_v61 = vrot.slane %v2727_v41, 2  ;;  %v2762_v13 = vadd.f32 %v2761_v42, %v2760_v40  ;;  %v2777_v40 = vld [vmem:[#allocation14 + $0x18] sm:$0xff]  ;;  %v2974_v42 = vld [vmem:[#allocation17 + $0x10] sm:$0xff] }
 0x797   :  { %v2737_v14 = vrot.slane %v2736_v44, 1  ;;  %v2748_v56 = vadd.f32 %v2747_v12, %v2746_v24  ;;  %v2768_v1 = vrot.slane %v2767_v37, 4  ;;  %v2659_v50 = vmax.f32 %v2635_v46, 0.0 }
 0x798   :  { %v2723_v51 = vrot.slane %v2722_v36, 1  ;;  %v2729_v43 = vadd.f32 %v2728_v61, %v2727_v41  ;;  %v2763_v21 = vrot.slane %v2762_v13, 2  ;;  %v2886_v15 = vsel %vm2794_vm6, %v2689_v54, %v4929_v55 }
 0x799   :  { %v2749_v62 = vrot.slane %v2748_v56, 2  ;;  %v2769_v29 = vadd.f32 %v2768_v1, %v2767_v37  ;;  %v2753_v49 = vsel %vm196_vm0, %v2659_v50, 0.0  ;;  %v2887_v45 = vsel %vm2796_vm7, %v2696_v30, %v2886_v15  ;;  %v2972_v30 = vld [vmem:[#allocation17] sm:$0xff] }
 0x79a   :  { %v2744_v5 = vrot.slane %v2743_v4, 1  ;;  %v2730_v58 = vrot.slane %v2729_v43, 1  ;;  %v2754_v60 = vrot.slane %v2753_v49, 4  ;;  %v2888_v39 = vsel %vm2798_vm8, %v2703_v20, %v2887_v45 }
 0x79b   :  { %v2750_v63 = vadd.f32 %v2749_v62, %v2748_v56  ;;  %v2770_v16 = vrot.slane %v2769_v29, 2  ;;  %v2889_v6 = vsel %vm2800_vm9, %v2710_v19, %v2888_v39  ;;  %v2724_v48 = vadd.f32 %v2723_v51, %v2722_v36  ;;  %v2973_v36 = vld [vmem:[#allocation17 + $0x8] sm:$0xff]  ;;  %v3243_v62 = vld [vmem:[%s5014_s15] ss:$0 sm:$0xff] }
 0x79c   :  { %v2731_v2 = vadd.f32 %v2730_v58, %v2729_v43  ;;  %v2755_v17 = vadd.f32 %v2754_v60, %v2753_v49  ;;  %v2890_v55 = vsel %vm2802_vm10, %v2717_v53, %v2889_v6  ;;  %v2738_v54 = vadd.f32 %v2737_v14, %v2736_v44  ;;  %v2776_v44 = vld [vmem:[#allocation14 + $0x10] sm:$0xff]  ;;  %v2975_v53 = vld [vmem:[#allocation17 + $0x18] sm:$0xff]  ;;  %v3058_v56 = vld [vmem:[%s5015_s16 + $0x8] sm:$0xff] }
 0x79d   :  { %v2764_v27 = vadd.f32 %v2763_v21, %v2762_v13  ;;  %v2751_v8 = vrot.slane %v2750_v63, 1  ;;  %v2745_v59 = vadd.f32 %v2744_v5, %v2743_v4  ;;  %v2771_v7 = vadd.f32 %v2770_v16, %v2769_v29  ;;  %v3242_v4 = vld [vmem:[%s5012_s13] ss:$0 sm:$0xff]  ;;  %v3059_v43 = vld [vmem:[%s5015_s16 + $0x10] sm:$0xff]  ;;  %v3060_v21 = vld [vmem:[%s5015_s16 + $0x18] sm:$0xff] }
 0x79e   :  { %v2791_v25 = vsel %vm2790_vm4, %v2731_v2, %v2724_v48  ;;  %v2756_v32 = vrot.slane %v2755_v17, 2  ;;  %v3724_v11 = vpack.c.bf16 %v2775_v0, %v2774_v34  ;;  %v3727_v28 = vpack.c.bf16 %v2777_v40, %v2776_v44  ;;  %v3057_v14 = vld [vmem:[%s5015_s16] sm:$0xff] }
 0x79f   :  { %v2793_v31 = vsel %vm2792_vm5, %v2738_v54, %v2791_v25  ;;  %v2752_v33 = vadd.f32 %v2751_v8, %v2750_v63  ;;  %v2765_v18 = vrot.slane %v2764_v27, 1  ;;  %v2772_v26 = vrot.slane %v2771_v7, 1 }
 0x7a0   :  { %v2795_v9 = vsel %vm2794_vm6, %v2745_v59, %v2793_v31  ;;  %v2757_v23 = vadd.f32 %v2756_v32, %v2755_v17  ;;  %v3730_v41 = vpack.c.bf16 %v2973_v36, %v2972_v30  ;;  %v3733_v12 = vpack.c.bf16 %v2975_v53, %v2974_v42 }
 0x7a1   :  { %v2797_v47 = vsel %vm2796_vm7, %v2752_v33, %v2795_v9  ;;  %v2766_v3 = vadd.f32 %v2765_v18, %v2764_v27  ;;  %v2773_v19 = vadd.f32 %v2772_v26, %v2771_v7  ;;  %v3736_v50 = vpack.c.bf16 %v3058_v56, %v3057_v14 }
 0x7a2   :  { %v2758_v10 = vrot.slane %v2757_v23, 1  ;;  %v3739_v15 = vpack.c.bf16 %v3060_v21, %v3059_v43 }
 0x7a4   :  { %v2759_v52 = vadd.f32 %v2758_v10, %v2757_v23 }
 0x7a6   :  { %v2799_v38 = vsel %vm2798_vm8, %v2759_v52, %v2797_v47 }
 0x7a7   :  { %v2801_v57 = vsel %vm2800_vm9, %v2766_v3, %v2799_v38 }
 0x7a8   :  { %v2803_v24 = vsel %vm2802_vm10, %v2773_v19, %v2801_v57 }
 0x7a9   :  { %3682 = vmatmul.mubr.msk.f32.vlgmr.msra.gmra.mrb[96].mxu1 %vm196_vm0, %v2803_v24 }
 0x7aa   :  { %3725 = vmatpush3.bf16.msra.mxu1 %v3724_v11  ;;  %3692 = vmatprep.mubr.msk.f32.mxu1 %vm4059_vm1, %v4058_v22 }
 0x7ab   :  { %3726 = vmatprep.subr.bf16.mxu1 %v4060_v35 }
 0x7ae   :  { %3728 = vmatpush3.bf16.msra.mxu1 %v3727_v28 }
 0x7af   :  { %3729 = vmatprep.subr.bf16.mxu1 %v4060_v35 }
 0x7b1   :  { %3693 = vmatmul.mubr.msk.f32.vlgmr.msra.gmra.mrb[98].mxu1 %vm196_vm0, %v2890_v55 }
 0x7b2   :  { %3703 = vmatprep.mubr.msk.f32.mxu1 %vm4059_vm1, %v4058_v22  ;;  %3731 = vmatpush3.bf16.msra.mxu1 %v3730_v41 }
 0x7b3   :  { %3732 = vmatprep.subr.bf16.mxu1 %v4060_v35 }
 0x7b6   :  { %3734 = vmatpush3.bf16.msra.mxu1 %v3733_v12 }
 0x7b7   :  { %3735 = vmatprep.subr.bf16.mxu1 %v4060_v35 }
 0x87c   :  { %v2872_v37 = vpop.f32.mrb[96].mxu1 }
 0x87d   :  { %v3683_v46 = vpop.f32.mrb[97].mxu1 }
 0x884   :  { %v2959_v20 = vpop.f32.mrb[98].mxu1 }
 0x885   :  { %v2960_v61 = vadd.f32 %v2959_v20, %v2872_v37  ;;  %v3694_v13 = vpop.f32.mrb[99].mxu1 }
 0x887   :  { %v2970_v1 = vadd.f32 %v3242_v4, %v2960_v61 }
 0x889   :  { %v2971_v51 = vmax.f32 %v2970_v1, 0.0 }
 0x88b   :  { %3704 = vmatmul.mubr.msk.f32.vlgmr.msra.gmra.mrb[100].mxu1 %vm196_vm0, %v2971_v51 }
 0x88c   :  { %3737 = vmatpush3.bf16.msra.mxu1 %v3736_v50  ;;  %3714 = vmatprep.mubr.msk.f32.mxu1 %vm4059_vm1, %v4058_v22 }
 0x88d   :  { %3738 = vmatprep.subr.bf16.mxu1 %v4060_v35  ;;  %v3245_v35 = vld [vmem:[%s5016_s17] ss:$0 sm:$0xff]  ;;  %s5028_s17 = sld [smem:[#allocation26_spill]] }
 0x890   :  { %3740 = vmatpush3.bf16.msra.mxu1 %v3739_v15 }
 0x95e   :  { %v3052_v29 = vpop.f32.mrb[100].mxu1 }
 0x95f   :  { %v3053_v49 = vadd.f32 %v3243_v62, %v3052_v29  ;;  %v3705_v45 = vpop.f32.mrb[101].mxu1 }
 0x961   :  { %v3056_v22 = vmax.f32 %v3053_v49, 0.0 }
 0x963   :  { %3715 = vmatmul.mubr.msk.f32.vlgmr.msra.gmra.mrb[102].mxu1 %vm196_vm0, %v3056_v22 }
 0xa36   :  { %v3137_v5 = vpop.f32.mrb[102].mxu1 }
 0xa37   :  { %v3138_v58 = vadd.f32 %v3245_v35, %v3137_v5  ;;  %v3716_v60 = vpop.f32.mrb[103].mxu1 }
 0xa39   :  { %v3142_v39 = vsel %vm3141_vm11, %v3138_v58, -inf }
 0xa3a   :  { %3143 = vmax.xlane.f32.xlu0 %v3142_v39 }
 0xac7   :  { %v3144_v63 = vpop.xlane.xlu0 %3143 }
 0xac8   :  { %v3145_v16 = vsub.f32 %v3138_v58, %v3144_v63 }
 0xaca   :  { %v3146_v6 = vmul.f32 1.442695, %v3145_v16 }
 0xacc   :  { %3835 = vpow2.f32 %v3146_v6 }
 0xad6   :  { %v3836_v48 = vpop.eup %3835 }
 0xad7   :  { %v3148_v2 = vsel %vm3141_vm11, %v3836_v48, 0.0 }
 0xad8   :  { %3149 = vadd.xlane.f32.xlu1 %v3148_v2 }
 0xb65   :  { %v3150_v17 = vpop.xlane.xlu1 %3149 }
 0xb66   :  { %3837 = vlog2.f32 %v3150_v17 }
 0xb70   :  { %v3838_v55 = vpop.eup %3837 }
 0xb71   :  { %v3152_v54 = vmul.f32 0.6931472, %v3838_v55 }
 0xb73   :  { %v3153_v27 = vsub.f32 %v3145_v16, %v3152_v54 }
 0xb75   :  { %3154 = vst.msk [vmem:[%s5028_s17] sm:$0xff] %vm3141_vm11, %v3153_v27 }
 0xb76   :  { %3159 = vsyncpa [#allocation5], 1 }
 0xb77   :  { %3160 = vsyncpa [#allocation7], 1 }
 0xb78   :  { %3161 = vsyncpa [#allocation10], 1 }
 0xb79   :  { %3162 = vsyncpa [#allocation13], 1 }
 0xb7a   :  { %3163 = vsyncpa [#allocation16], 1 }

</bundles_post_ra>
